<compile_context>
chip_gen: v6e
topology: v6e:2x2x1
jax: 0.10.0
libtpu: 0.0.40
codegen_flags: <defaults>
</compile_context>

<pallas_src>
import functools

import jax
import jax.numpy as jnp
from jax.experimental import pallas as pl
from jax.experimental.pallas import tpu as pltpu


def _layer_norm(x, w, b, eps=1e-5):
    mean = jnp.mean(x, axis=-1, keepdims=True)
    var = jnp.mean(jnp.square(x - mean), axis=-1, keepdims=True)
    return (x - mean) * jax.lax.rsqrt(var + eps) * w + b


# ----------------------------------------------------------------------------
# Fused stage kernel:
#   x   = LN_a(q + OutProj(MHA(q, kv, kv)))          (also emits averaged attn map)
#   out = LN_f(x + FFN(x) [+ extra if pre_norm]) [+ extra if post_norm]
# Grid: (B, num_q_tiles); one (tq, D) query tile per step, full kv per step.
# ----------------------------------------------------------------------------
def _stage_kernel(q_ref, kv_ref, extra_ref,
                  wq_ref, wk_ref, wv_ref, bq_ref, bk_ref, bv_ref,
                  wo_ref, bo_ref, lnaw_ref, lnab_ref,
                  w1_ref, b1_ref, w2_ref, b2_ref, lnfw_ref, lnfb_ref,
                  out_ref, map_ref, *, num_heads, extra_mode, lkv_valid):
    f32 = jnp.float32
    q_in = q_ref[0]                       # (tq, D), compute dtype (bf16)
    kv_in = kv_ref[0]                     # (Lkv, D)
    compute_dtype = q_in.dtype
    tq, D = q_in.shape
    Lkv = kv_in.shape[0]
    dh = D // num_heads
    scale = 1.0 / float(dh) ** 0.5

    # QKV projections: bf16 operands on the MXU, f32 accumulation.
    Q = jnp.dot(q_in, wq_ref[...], preferred_element_type=f32) + bq_ref[...]
    K = jnp.dot(kv_in, wk_ref[...], preferred_element_type=f32) + bk_ref[...]
    V = jnp.dot(kv_in, wv_ref[...], preferred_element_type=f32) + bv_ref[...]

    # Fold the 1/sqrt(dh) scale into Q once (PyTorch scales q before the matmul).
    Qc = (Q * scale).astype(compute_dtype)
    Kc = K.astype(compute_dtype)
    Vc = V.astype(compute_dtype)
    Wo = wo_ref[...]                      # (D, D), compute dtype

    attn_acc = jnp.zeros((tq, D), f32)    # accumulated output projection
    map_acc = jnp.zeros((tq, Lkv), f32)   # sum of per-head attention probs
    for h in range(num_heads):            # static unrolled head loop
        sl = slice(h * dh, (h + 1) * dh)
        s = jnp.dot(Qc[:, sl], Kc[:, sl].T, preferred_element_type=f32)
        s = s - jnp.max(s, axis=-1, keepdims=True)
        e = jnp.exp(s)
        p = e * pl.reciprocal(jnp.sum(e, axis=-1, keepdims=True), approx=True)
        map_acc = map_acc + p
        ctx = jnp.dot(p.astype(compute_dtype), Vc[:, sl],
                      preferred_element_type=f32)                 # (tq, dh)
        # Fuse the head-concat into the output projection (sublane slice of Wo).
        attn_acc = attn_acc + jnp.dot(ctx.astype(compute_dtype), Wo[sl, :],
                                      preferred_element_type=f32)

    attn_out = attn_acc + bo_ref[...]
    x = q_in.astype(f32) + attn_out                               # residual 1
    x = _layer_norm(x, lnaw_ref[...], lnab_ref[...])              # LN_a

    # FFN (Linear -> ReLU -> Linear), bf16 matmuls, f32 accumulate.
    h1 = jnp.dot(x.astype(compute_dtype), w1_ref[...],
                 preferred_element_type=f32) + b1_ref[...]
    h1 = jnp.maximum(h1, 0.0)
    y = jnp.dot(h1.astype(compute_dtype), w2_ref[...],
                preferred_element_type=f32) + b2_ref[...]

    z = x + y                                                     # residual 2
    if extra_mode == "pre_norm":                                  # + pos before LN
        z = z + extra_ref[0].astype(f32)
    z = _layer_norm(z, lnfw_ref[...], lnfb_ref[...])              # LN_f
    if extra_mode == "post_norm":                                 # + original_prompts after LN
        z = z + extra_ref[0].astype(f32)
    out_ref[0] = z.astype(out_ref.dtype)

    # Averaged attention map; pad last (lane) dim to a multiple of 128 so the
    # store is lane-dense (wrapper slices the padding off).
    amap = map_acc * (1.0 / num_heads)
    pad = map_ref.shape[2] - lkv_valid
    if pad > 0:
        amap = jnp.concatenate([amap, jnp.zeros((tq, pad), f32)], axis=-1)
    map_ref[0] = amap.astype(map_ref.dtype)


def _attn_ffn_stage(q, kv, extra, attn_params, ln_attn, ffn_params, ln_ffn,
                    num_heads, extra_mode, compute_dtype=jnp.bfloat16):
    """Fused stage: returns (stage_output, averaged_attention_map)."""
    B, Lq, D = q.shape
    Lkv = kv.shape[1]
    assert D % num_heads == 0
    wq, wk, wv, bq, bk, bv, wo, bo = attn_params
    w1, b1, w2, b2 = ffn_params
    lnaw, lnab = ln_attn
    lnfw, lnfb = ln_ffn
    Dff = w1.shape[1]
    out_dtype = q.dtype

    lkv_pad = pl.cdiv(Lkv, 128) * 128          # lane-dense attn-map store
    tq = Lq if Lq <= 256 else 256              # Lq tiling for big sequences
    nq = pl.cdiv(Lq, tq)

    to_c = lambda a: a.astype(compute_dtype)
    to_f = lambda a: a.astype(jnp.float32)

    # Activations / matmul weights in compute dtype; biases + LN params in f32.
    q_c, kv_c, extra_c = to_c(q), to_c(kv), to_c(extra)
    wq_c, wk_c, wv_c, wo_c, w1_c, w2_c = map(to_c, (wq, wk, wv, wo, w1, w2))
    bq_f, bk_f, bv_f, bo_f, b1_f, b2_f = map(to_f, (bq, bk, bv, bo, b1, b2))
    lnaw_f, lnab_f, lnfw_f, lnfb_f = map(to_f, (lnaw, lnab, lnfw, lnfb))

    qt_spec = pl.BlockSpec((1, tq, D), lambda b, qi: (b, qi, 0))
    kv_spec = pl.BlockSpec((1, Lkv, D), lambda b, qi: (b, 0, 0))
    const = lambda shape: pl.BlockSpec(shape, lambda b, qi: (0, 0))

    kernel = functools.partial(_stage_kernel, num_heads=num_heads,
                               extra_mode=extra_mode, lkv_valid=Lkv)

    out, amap = pl.pallas_call(
        kernel,
        out_shape=(jax.ShapeDtypeStruct((B, Lq, D), out_dtype),
                   jax.ShapeDtypeStruct((B, Lq, lkv_pad), jnp.float32)),
        grid=(B, nq),
        in_specs=[qt_spec, kv_spec, qt_spec,
                  const((D, D)), const((D, D)), const((D, D)),
                  const((1, D)), const((1, D)), const((1, D)),
                  const((D, D)), const((1, D)),
                  const((1, D)), const((1, D)),
                  const((D, Dff)), const((1, Dff)),
                  const((Dff, D)), const((1, D)),
                  const((1, D)), const((1, D))],
        out_specs=(qt_spec,
                   pl.BlockSpec((1, tq, lkv_pad), lambda b, qi: (b, qi, 0))),
        compiler_params=pltpu.CompilerParams(
            dimension_semantics=("parallel", "parallel")),
    )(q_c, kv_c, extra_c,
      wq_c, wk_c, wv_c, bq_f, bk_f, bv_f, wo_c, bo_f, lnaw_f, lnab_f,
      w1_c, b1_f, w2_c, b2_f, lnfw_f, lnfb_f)

    if lkv_pad != Lkv:
        amap = amap[:, :, :Lkv]
    return out, amap


# ----------------------------------------------------------------------------
# Full CrossAttentionBlockMap forward
# ----------------------------------------------------------------------------
def cross_attention_block_map(images, prompts_input, original_prompts,
                              pos_encodings, params, num_heads, add_pos=True,
                              compute_dtype=jnp.bfloat16):
    # Stage A: CrossAttention1 (q=prompts, kv=images) + LN1, FFN1 + LN2,
    #          then + original_prompts (fused into the kernel epilogue).
    prompts_output, prompt_to_image_attn = _attn_ffn_stage(
        prompts_input, images, original_prompts,
        params["attn1"], params["ln1"], params["ffn1"], params["ln2"],
        num_heads, extra_mode="post_norm", compute_dtype=compute_dtype)

    # Stage B: CrossAttention2 (q=images, kv=prompts_output) + LN3, FFN2 + pos + LN4.
    images_out, image_to_prompt_attn = _attn_ffn_stage(
        images, prompts_output, pos_encodings,
        params["attn2"], params["ln3"], params["ffn2"], params["ln4"],
        num_heads, extra_mode=("pre_norm" if add_pos else "none"),
        compute_dtype=compute_dtype)

    return images_out, prompts_output, prompt_to_image_attn, image_to_prompt_attn


# ----------------------------------------------------------------------------
# Deterministic parameter initialization
# ----------------------------------------------------------------------------
def init_params(key, d_model, d_ff):
    ks = list(jax.random.split(key, 16))

    def attn(k):
        ka = jax.random.split(k, 8)
        return (0.05 * jax.random.normal(ka[0], (d_model, d_model), jnp.float32),  # Wq
                0.05 * jax.random.normal(ka[1], (d_model, d_model), jnp.float32),  # Wk
                0.05 * jax.random.normal(ka[2], (d_model, d_model), jnp.float32),  # Wv
                0.05 * jax.random.normal(ka[3], (1, d_model), jnp.float32),        # bq
                0.05 * jax.random.normal(ka[4], (1, d_model), jnp.float32),        # bk
                0.05 * jax.random.normal(ka[5], (1, d_model), jnp.float32),        # bv
                0.05 * jax.random.normal(ka[6], (d_model, d_model), jnp.float32),  # Wo
                0.05 * jax.random.normal(ka[7], (1, d_model), jnp.float32))        # bo

    def ffn(k):
        kf = jax.random.split(k, 4)
        return (0.05 * jax.random.normal(kf[0], (d_model, d_ff), jnp.float32),
                0.05 * jax.random.normal(kf[1], (1, d_ff), jnp.float32),
                0.05 * jax.random.normal(kf[2], (d_ff, d_model), jnp.float32),
                0.05 * jax.random.normal(kf[3], (1, d_model), jnp.float32))

    def ln():  # PyTorch default LayerNorm init
        return (jnp.ones((1, d_model), jnp.float32),
                jnp.zeros((1, d_model), jnp.float32))

    return {"attn1": attn(ks[0]), "attn2": attn(ks[1]),
            "ffn1": ffn(ks[2]), "ffn2": ffn(ks[3]),
            "ln1": ln(), "ln2": ln(), "ln3": ln(), "ln4": ln()}


if __name__ == "__main__":
    B, Np, Ni, D, H = 2, 8, 16, 32, 4          # batch, prompts, image tokens, d_model, heads
    D_FF = 4 * D

    key = jax.random.PRNGKey(0)
    k_img, k_prm, k_orig, k_pos, k_par = jax.random.split(key, 5)

    images = jax.random.normal(k_img, (B, Ni, D), jnp.float32)
    prompts_input = jax.random.normal(k_prm, (B, Np, D), jnp.float32)
    original_prompts = jax.random.normal(k_orig, (B, Np, D), jnp.float32)
    pos_encodings = jax.random.normal(k_pos, (B, Ni, D), jnp.float32)

    params = init_params(k_par, D, D_FF)

    out = cross_attention_block_map(images, prompts_input, original_prompts,
                                    pos_encodings, params, num_heads=H,
                                    add_pos=True)
    out = jax.tree_util.tree_map(jax.block_until_ready, out)

    images_out, prompts_out, p2i_attn, i2p_attn = out
    assert images_out.shape == (B, Ni, D)
    assert prompts_out.shape == (B, Np, D)
    assert p2i_attn.shape == (B, Np, Ni)
    assert i2p_attn.shape == (B, Ni, Np)
    assert bool(jnp.all(jnp.isfinite(images_out)))
    assert bool(jnp.all(jnp.isfinite(prompts_out)))
    # attention rows should (approximately) sum to 1
    assert bool(jnp.all(jnp.abs(p2i_attn.sum(-1) - 1.0) < 5e-2))
    assert bool(jnp.all(jnp.abs(i2p_attn.sum(-1) - 1.0) < 5e-2))
    print("KERNEL_OK")
</pallas_src>

<mosaic_0001>
module attributes {stable_mosaic.version = 11 : i64} {
  func.func @_stage_kernel(%arg0: i32, %arg1: i32, %arg2: memref<1x8x32xbf16, #tpu.memory_space<vmem>>, %arg3: memref<1x16x32xbf16, #tpu.memory_space<vmem>>, %arg4: memref<1x8x32xbf16, #tpu.memory_space<vmem>>, %arg5: memref<32x32xbf16, #tpu.memory_space<vmem>>, %arg6: memref<32x32xbf16, #tpu.memory_space<vmem>>, %arg7: memref<32x32xbf16, #tpu.memory_space<vmem>>, %arg8: memref<1x32xf32, #tpu.memory_space<vmem>>, %arg9: memref<1x32xf32, #tpu.memory_space<vmem>>, %arg10: memref<1x32xf32, #tpu.memory_space<vmem>>, %arg11: memref<32x32xbf16, #tpu.memory_space<vmem>>, %arg12: memref<1x32xf32, #tpu.memory_space<vmem>>, %arg13: memref<1x32xf32, #tpu.memory_space<vmem>>, %arg14: memref<1x32xf32, #tpu.memory_space<vmem>>, %arg15: memref<32x128xbf16, #tpu.memory_space<vmem>>, %arg16: memref<1x128xf32, #tpu.memory_space<vmem>>, %arg17: memref<128x32xbf16, #tpu.memory_space<vmem>>, %arg18: memref<1x32xf32, #tpu.memory_space<vmem>>, %arg19: memref<1x32xf32, #tpu.memory_space<vmem>>, %arg20: memref<1x32xf32, #tpu.memory_space<vmem>>, %arg21: memref<1x8x32xf32, #tpu.memory_space<vmem>>, %arg22: memref<1x8x128xf32, #tpu.memory_space<vmem>>) attributes {dimension_semantics = [#tpu.dimension_semantics<parallel>, #tpu.dimension_semantics<parallel>], iteration_bounds = array<i64: 2, 1>, scalar_prefetch = 0 : i64, scratch_operands = 0 : i64, tpu.core_type = #tpu.core_type<tc>, window_params = [{transform_indices = @transform_0, window_bounds = array<i64: 1, 8, 32>}, {transform_indices = @transform_1, window_bounds = array<i64: 1, 16, 32>}, {transform_indices = @transform_2, window_bounds = array<i64: 1, 8, 32>}, {pipeline_mode = #tpu.pipeline_mode<synchronous>, transform_indices = @transform_3, window_bounds = array<i64: 32, 32>}, {pipeline_mode = #tpu.pipeline_mode<synchronous>, transform_indices = @transform_4, window_bounds = array<i64: 32, 32>}, {pipeline_mode = #tpu.pipeline_mode<synchronous>, transform_indices = @transform_5, window_bounds = array<i64: 32, 32>}, {pipeline_mode = #tpu.pipeline_mode<synchronous>, transform_indices = @transform_6, window_bounds = array<i64: 1, 32>}, {pipeline_mode = #tpu.pipeline_mode<synchronous>, transform_indices = @transform_7, window_bounds = array<i64: 1, 32>}, {pipeline_mode = #tpu.pipeline_mode<synchronous>, transform_indices = @transform_8, window_bounds = array<i64: 1, 32>}, {pipeline_mode = #tpu.pipeline_mode<synchronous>, transform_indices = @transform_9, window_bounds = array<i64: 32, 32>}, {pipeline_mode = #tpu.pipeline_mode<synchronous>, transform_indices = @transform_10, window_bounds = array<i64: 1, 32>}, {pipeline_mode = #tpu.pipeline_mode<synchronous>, transform_indices = @transform_11, window_bounds = array<i64: 1, 32>}, {pipeline_mode = #tpu.pipeline_mode<synchronous>, transform_indices = @transform_12, window_bounds = array<i64: 1, 32>}, {pipeline_mode = #tpu.pipeline_mode<synchronous>, transform_indices = @transform_13, window_bounds = array<i64: 32, 128>}, {pipeline_mode = #tpu.pipeline_mode<synchronous>, transform_indices = @transform_14, window_bounds = array<i64: 1, 128>}, {pipeline_mode = #tpu.pipeline_mode<synchronous>, transform_indices = @transform_15, window_bounds = array<i64: 128, 32>}, {pipeline_mode = #tpu.pipeline_mode<synchronous>, transform_indices = @transform_16, window_bounds = array<i64: 1, 32>}, {pipeline_mode = #tpu.pipeline_mode<synchronous>, transform_indices = @transform_17, window_bounds = array<i64: 1, 32>}, {pipeline_mode = #tpu.pipeline_mode<synchronous>, transform_indices = @transform_18, window_bounds = array<i64: 1, 32>}, {transform_indices = @transform_19, window_bounds = array<i64: 1, 8, 32>}, {transform_indices = @transform_20, window_bounds = array<i64: 1, 8, 128>}]} {
    %c0 = arith.constant 0 : index
    %c0_0 = arith.constant 0 : index
    %c0_1 = arith.constant 0 : index
    %0 = vector.load %arg2[%c0, %c0_0, %c0_1] : memref<1x8x32xbf16, #tpu.memory_space<vmem>>, vector<1x8x32xbf16>
    %1 = vector.shape_cast %0 : vector<1x8x32xbf16> to vector<8x32xbf16>
    %c0_2 = arith.constant 0 : index
    %c0_3 = arith.constant 0 : index
    %c0_4 = arith.constant 0 : index
    %2 = vector.load %arg3[%c0_2, %c0_3, %c0_4] : memref<1x16x32xbf16, #tpu.memory_space<vmem>>, vector<1x16x32xbf16>
    %3 = vector.shape_cast %2 : vector<1x16x32xbf16> to vector<16x32xbf16>
    %c0_5 = arith.constant 0 : index
    %c0_6 = arith.constant 0 : index
    %4 = vector.load %arg5[%c0_5, %c0_6] : memref<32x32xbf16, #tpu.memory_space<vmem>>, vector<32x32xbf16>
    %cst = arith.constant dense<0.000000e+00> : vector<8x32xf32>
    %5 = tpu.matmul %1, %4, %cst {dimension_numbers = #tpu.dot_dimension_numbers<[1], [0], [0], [1], [0, 0, 1, 1], [], []>} : vector<8x32xbf16>, vector<32x32xbf16>, vector<8x32xf32> -> vector<8x32xf32>
    %c0_7 = arith.constant 0 : index
    %c0_8 = arith.constant 0 : index
    %6 = vector.load %arg8[%c0_7, %c0_8] : memref<1x32xf32, #tpu.memory_space<vmem>>, vector<1x32xf32>
    %7 = vector.broadcast %6 : vector<1x32xf32> to vector<8x32xf32>
    %8 = arith.addf %5, %7 : vector<8x32xf32>
    %c0_9 = arith.constant 0 : index
    %c0_10 = arith.constant 0 : index
    %9 = vector.load %arg6[%c0_9, %c0_10] : memref<32x32xbf16, #tpu.memory_space<vmem>>, vector<32x32xbf16>
    %cst_11 = arith.constant dense<0.000000e+00> : vector<16x32xf32>
    %10 = tpu.matmul %3, %9, %cst_11 {dimension_numbers = #tpu.dot_dimension_numbers<[1], [0], [0], [1], [0, 0, 1, 1], [], []>} : vector<16x32xbf16>, vector<32x32xbf16>, vector<16x32xf32> -> vector<16x32xf32>
    %c0_12 = arith.constant 0 : index
    %c0_13 = arith.constant 0 : index
    %11 = vector.load %arg9[%c0_12, %c0_13] : memref<1x32xf32, #tpu.memory_space<vmem>>, vector<1x32xf32>
    %12 = vector.broadcast %11 : vector<1x32xf32> to vector<16x32xf32>
    %13 = arith.addf %10, %12 : vector<16x32xf32>
    %c0_14 = arith.constant 0 : index
    %c0_15 = arith.constant 0 : index
    %14 = vector.load %arg7[%c0_14, %c0_15] : memref<32x32xbf16, #tpu.memory_space<vmem>>, vector<32x32xbf16>
    %cst_16 = arith.constant dense<0.000000e+00> : vector<16x32xf32>
    %15 = tpu.matmul %3, %14, %cst_16 {dimension_numbers = #tpu.dot_dimension_numbers<[1], [0], [0], [1], [0, 0, 1, 1], [], []>} : vector<16x32xbf16>, vector<32x32xbf16>, vector<16x32xf32> -> vector<16x32xf32>
    %c0_17 = arith.constant 0 : index
    %c0_18 = arith.constant 0 : index
    %16 = vector.load %arg10[%c0_17, %c0_18] : memref<1x32xf32, #tpu.memory_space<vmem>>, vector<1x32xf32>
    %17 = vector.broadcast %16 : vector<1x32xf32> to vector<16x32xf32>
    %18 = arith.addf %15, %17 : vector<16x32xf32>
    %cst_19 = arith.constant 0.353553385 : f32
    %19 = vector.broadcast %cst_19 : f32 to vector<8x32xf32>
    %20 = arith.mulf %8, %19 : vector<8x32xf32>
    %21 = arith.truncf %20 : vector<8x32xf32> to vector<8x32xbf16>
    %22 = arith.truncf %13 : vector<16x32xf32> to vector<16x32xbf16>
    %23 = arith.truncf %18 : vector<16x32xf32> to vector<16x32xbf16>
    %c0_20 = arith.constant 0 : index
    %c0_21 = arith.constant 0 : index
    %24 = vector.load %arg11[%c0_20, %c0_21] : memref<32x32xbf16, #tpu.memory_space<vmem>>, vector<32x32xbf16>
    %cst_22 = arith.constant 0.000000e+00 : f32
    %25 = vector.broadcast %cst_22 : f32 to vector<8x32xf32>
    %cst_23 = arith.constant 0.000000e+00 : f32
    %26 = vector.broadcast %cst_23 : f32 to vector<8x16xf32>
    %27 = vector.extract_strided_slice %21 {offsets = [0, 0], sizes = [8, 8], strides = [1, 1]} : vector<8x32xbf16> to vector<8x8xbf16>
    %28 = vector.extract_strided_slice %22 {offsets = [0, 0], sizes = [16, 8], strides = [1, 1]} : vector<16x32xbf16> to vector<16x8xbf16>
    %29 = tpu.transpose %28, [1, 0] : vector<16x8xbf16> -> vector<8x16xbf16>
    %cst_24 = arith.constant dense<0.000000e+00> : vector<8x16xf32>
    %30 = tpu.matmul %27, %29, %cst_24 {dimension_numbers = #tpu.dot_dimension_numbers<[1], [0], [0], [1], [0, 0, 1, 1], [], []>} : vector<8x8xbf16>, vector<8x16xbf16>, vector<8x16xf32> -> vector<8x16xf32>
    %cst_25 = arith.constant dense<0xFF800000> : vector<8xf32>
    %31 = vector.multi_reduction <maximumf>, %30, %cst_25 [1] : vector<8x16xf32> to vector<8xf32>
    %32 = vector.shape_cast %31 : vector<8xf32> to vector<8x1xf32>
    %33 = vector.broadcast %32 : vector<8x1xf32> to vector<8x16xf32>
    %34 = arith.subf %30, %33 : vector<8x16xf32>
    %35 = math.exp %34 : vector<8x16xf32>
    %cst_26 = arith.constant dense<0.000000e+00> : vector<8xf32>
    %36 = vector.multi_reduction <add>, %35, %cst_26 [1] : vector<8x16xf32> to vector<8xf32>
    %37 = vector.shape_cast %36 : vector<8xf32> to vector<8x1xf32>
    %38 = tpu.reciprocal %37 {approx = true} : vector<8x1xf32> -> vector<8x1xf32>
    %39 = vector.broadcast %38 : vector<8x1xf32> to vector<8x16xf32>
    %40 = arith.mulf %35, %39 : vector<8x16xf32>
    %41 = arith.addf %26, %40 : vector<8x16xf32>
    %42 = arith.truncf %40 : vector<8x16xf32> to vector<8x16xbf16>
    %43 = vector.extract_strided_slice %23 {offsets = [0, 0], sizes = [16, 8], strides = [1, 1]} : vector<16x32xbf16> to vector<16x8xbf16>
    %cst_27 = arith.constant dense<0.000000e+00> : vector<8x8xf32>
    %44 = tpu.matmul %42, %43, %cst_27 {dimension_numbers = #tpu.dot_dimension_numbers<[1], [0], [0], [1], [0, 0, 1, 1], [], []>} : vector<8x16xbf16>, vector<16x8xbf16>, vector<8x8xf32> -> vector<8x8xf32>
    %45 = arith.truncf %44 : vector<8x8xf32> to vector<8x8xbf16>
    %46 = vector.extract_strided_slice %24 {offsets = [0, 0], sizes = [8, 32], strides = [1, 1]} : vector<32x32xbf16> to vector<8x32xbf16>
    %cst_28 = arith.constant dense<0.000000e+00> : vector<8x32xf32>
    %47 = tpu.matmul %45, %46, %cst_28 {dimension_numbers = #tpu.dot_dimension_numbers<[1], [0], [0], [1], [0, 0, 1, 1], [], []>} : vector<8x8xbf16>, vector<8x32xbf16>, vector<8x32xf32> -> vector<8x32xf32>
    %48 = arith.addf %25, %47 : vector<8x32xf32>
    %49 = vector.extract_strided_slice %21 {offsets = [0, 8], sizes = [8, 8], strides = [1, 1]} : vector<8x32xbf16> to vector<8x8xbf16>
    %50 = vector.extract_strided_slice %22 {offsets = [0, 8], sizes = [16, 8], strides = [1, 1]} : vector<16x32xbf16> to vector<16x8xbf16>
    %51 = tpu.transpose %50, [1, 0] : vector<16x8xbf16> -> vector<8x16xbf16>
    %cst_29 = arith.constant dense<0.000000e+00> : vector<8x16xf32>
    %52 = tpu.matmul %49, %51, %cst_29 {dimension_numbers = #tpu.dot_dimension_numbers<[1], [0], [0], [1], [0, 0, 1, 1], [], []>} : vector<8x8xbf16>, vector<8x16xbf16>, vector<8x16xf32> -> vector<8x16xf32>
    %cst_30 = arith.constant dense<0xFF800000> : vector<8xf32>
    %53 = vector.multi_reduction <maximumf>, %52, %cst_30 [1] : vector<8x16xf32> to vector<8xf32>
    %54 = vector.shape_cast %53 : vector<8xf32> to vector<8x1xf32>
    %55 = vector.broadcast %54 : vector<8x1xf32> to vector<8x16xf32>
    %56 = arith.subf %52, %55 : vector<8x16xf32>
    %57 = math.exp %56 : vector<8x16xf32>
    %cst_31 = arith.constant dense<0.000000e+00> : vector<8xf32>
    %58 = vector.multi_reduction <add>, %57, %cst_31 [1] : vector<8x16xf32> to vector<8xf32>
    %59 = vector.shape_cast %58 : vector<8xf32> to vector<8x1xf32>
    %60 = tpu.reciprocal %59 {approx = true} : vector<8x1xf32> -> vector<8x1xf32>
    %61 = vector.broadcast %60 : vector<8x1xf32> to vector<8x16xf32>
    %62 = arith.mulf %57, %61 : vector<8x16xf32>
    %63 = arith.addf %41, %62 : vector<8x16xf32>
    %64 = arith.truncf %62 : vector<8x16xf32> to vector<8x16xbf16>
    %65 = vector.extract_strided_slice %23 {offsets = [0, 8], sizes = [16, 8], strides = [1, 1]} : vector<16x32xbf16> to vector<16x8xbf16>
    %cst_32 = arith.constant dense<0.000000e+00> : vector<8x8xf32>
    %66 = tpu.matmul %64, %65, %cst_32 {dimension_numbers = #tpu.dot_dimension_numbers<[1], [0], [0], [1], [0, 0, 1, 1], [], []>} : vector<8x16xbf16>, vector<16x8xbf16>, vector<8x8xf32> -> vector<8x8xf32>
    %67 = arith.truncf %66 : vector<8x8xf32> to vector<8x8xbf16>
    %68 = vector.extract_strided_slice %24 {offsets = [8, 0], sizes = [8, 32], strides = [1, 1]} : vector<32x32xbf16> to vector<8x32xbf16>
    %cst_33 = arith.constant dense<0.000000e+00> : vector<8x32xf32>
    %69 = tpu.matmul %67, %68, %cst_33 {dimension_numbers = #tpu.dot_dimension_numbers<[1], [0], [0], [1], [0, 0, 1, 1], [], []>} : vector<8x8xbf16>, vector<8x32xbf16>, vector<8x32xf32> -> vector<8x32xf32>
    %70 = arith.addf %48, %69 : vector<8x32xf32>
    %71 = vector.extract_strided_slice %21 {offsets = [0, 16], sizes = [8, 8], strides = [1, 1]} : vector<8x32xbf16> to vector<8x8xbf16>
    %72 = vector.extract_strided_slice %22 {offsets = [0, 16], sizes = [16, 8], strides = [1, 1]} : vector<16x32xbf16> to vector<16x8xbf16>
    %73 = tpu.transpose %72, [1, 0] : vector<16x8xbf16> -> vector<8x16xbf16>
    %cst_34 = arith.constant dense<0.000000e+00> : vector<8x16xf32>
    %74 = tpu.matmul %71, %73, %cst_34 {dimension_numbers = #tpu.dot_dimension_numbers<[1], [0], [0], [1], [0, 0, 1, 1], [], []>} : vector<8x8xbf16>, vector<8x16xbf16>, vector<8x16xf32> -> vector<8x16xf32>
    %cst_35 = arith.constant dense<0xFF800000> : vector<8xf32>
    %75 = vector.multi_reduction <maximumf>, %74, %cst_35 [1] : vector<8x16xf32> to vector<8xf32>
    %76 = vector.shape_cast %75 : vector<8xf32> to vector<8x1xf32>
    %77 = vector.broadcast %76 : vector<8x1xf32> to vector<8x16xf32>
    %78 = arith.subf %74, %77 : vector<8x16xf32>
    %79 = math.exp %78 : vector<8x16xf32>
    %cst_36 = arith.constant dense<0.000000e+00> : vector<8xf32>
    %80 = vector.multi_reduction <add>, %79, %cst_36 [1] : vector<8x16xf32> to vector<8xf32>
    %81 = vector.shape_cast %80 : vector<8xf32> to vector<8x1xf32>
    %82 = tpu.reciprocal %81 {approx = true} : vector<8x1xf32> -> vector<8x1xf32>
    %83 = vector.broadcast %82 : vector<8x1xf32> to vector<8x16xf32>
    %84 = arith.mulf %79, %83 : vector<8x16xf32>
    %85 = arith.addf %63, %84 : vector<8x16xf32>
    %86 = arith.truncf %84 : vector<8x16xf32> to vector<8x16xbf16>
    %87 = vector.extract_strided_slice %23 {offsets = [0, 16], sizes = [16, 8], strides = [1, 1]} : vector<16x32xbf16> to vector<16x8xbf16>
    %cst_37 = arith.constant dense<0.000000e+00> : vector<8x8xf32>
    %88 = tpu.matmul %86, %87, %cst_37 {dimension_numbers = #tpu.dot_dimension_numbers<[1], [0], [0], [1], [0, 0, 1, 1], [], []>} : vector<8x16xbf16>, vector<16x8xbf16>, vector<8x8xf32> -> vector<8x8xf32>
    %89 = arith.truncf %88 : vector<8x8xf32> to vector<8x8xbf16>
    %90 = vector.extract_strided_slice %24 {offsets = [16, 0], sizes = [8, 32], strides = [1, 1]} : vector<32x32xbf16> to vector<8x32xbf16>
    %cst_38 = arith.constant dense<0.000000e+00> : vector<8x32xf32>
    %91 = tpu.matmul %89, %90, %cst_38 {dimension_numbers = #tpu.dot_dimension_numbers<[1], [0], [0], [1], [0, 0, 1, 1], [], []>} : vector<8x8xbf16>, vector<8x32xbf16>, vector<8x32xf32> -> vector<8x32xf32>
    %92 = arith.addf %70, %91 : vector<8x32xf32>
    %93 = vector.extract_strided_slice %21 {offsets = [0, 24], sizes = [8, 8], strides = [1, 1]} : vector<8x32xbf16> to vector<8x8xbf16>
    %94 = vector.extract_strided_slice %22 {offsets = [0, 24], sizes = [16, 8], strides = [1, 1]} : vector<16x32xbf16> to vector<16x8xbf16>
    %95 = tpu.transpose %94, [1, 0] : vector<16x8xbf16> -> vector<8x16xbf16>
    %cst_39 = arith.constant dense<0.000000e+00> : vector<8x16xf32>
    %96 = tpu.matmul %93, %95, %cst_39 {dimension_numbers = #tpu.dot_dimension_numbers<[1], [0], [0], [1], [0, 0, 1, 1], [], []>} : vector<8x8xbf16>, vector<8x16xbf16>, vector<8x16xf32> -> vector<8x16xf32>
    %cst_40 = arith.constant dense<0xFF800000> : vector<8xf32>
    %97 = vector.multi_reduction <maximumf>, %96, %cst_40 [1] : vector<8x16xf32> to vector<8xf32>
    %98 = vector.shape_cast %97 : vector<8xf32> to vector<8x1xf32>
    %99 = vector.broadcast %98 : vector<8x1xf32> to vector<8x16xf32>
    %100 = arith.subf %96, %99 : vector<8x16xf32>
    %101 = math.exp %100 : vector<8x16xf32>
    %cst_41 = arith.constant dense<0.000000e+00> : vector<8xf32>
    %102 = vector.multi_reduction <add>, %101, %cst_41 [1] : vector<8x16xf32> to vector<8xf32>
    %103 = vector.shape_cast %102 : vector<8xf32> to vector<8x1xf32>
    %104 = tpu.reciprocal %103 {approx = true} : vector<8x1xf32> -> vector<8x1xf32>
    %105 = vector.broadcast %104 : vector<8x1xf32> to vector<8x16xf32>
    %106 = arith.mulf %101, %105 : vector<8x16xf32>
    %107 = arith.addf %85, %106 : vector<8x16xf32>
    %108 = arith.truncf %106 : vector<8x16xf32> to vector<8x16xbf16>
    %109 = vector.extract_strided_slice %23 {offsets = [0, 24], sizes = [16, 8], strides = [1, 1]} : vector<16x32xbf16> to vector<16x8xbf16>
    %cst_42 = arith.constant dense<0.000000e+00> : vector<8x8xf32>
    %110 = tpu.matmul %108, %109, %cst_42 {dimension_numbers = #tpu.dot_dimension_numbers<[1], [0], [0], [1], [0, 0, 1, 1], [], []>} : vector<8x16xbf16>, vector<16x8xbf16>, vector<8x8xf32> -> vector<8x8xf32>
    %111 = arith.truncf %110 : vector<8x8xf32> to vector<8x8xbf16>
    %112 = vector.extract_strided_slice %24 {offsets = [24, 0], sizes = [8, 32], strides = [1, 1]} : vector<32x32xbf16> to vector<8x32xbf16>
    %cst_43 = arith.constant dense<0.000000e+00> : vector<8x32xf32>
    %113 = tpu.matmul %111, %112, %cst_43 {dimension_numbers = #tpu.dot_dimension_numbers<[1], [0], [0], [1], [0, 0, 1, 1], [], []>} : vector<8x8xbf16>, vector<8x32xbf16>, vector<8x32xf32> -> vector<8x32xf32>
    %114 = arith.addf %92, %113 : vector<8x32xf32>
    %c0_44 = arith.constant 0 : index
    %c0_45 = arith.constant 0 : index
    %115 = vector.load %arg12[%c0_44, %c0_45] : memref<1x32xf32, #tpu.memory_space<vmem>>, vector<1x32xf32>
    %116 = vector.broadcast %115 : vector<1x32xf32> to vector<8x32xf32>
    %117 = arith.addf %114, %116 : vector<8x32xf32>
    %118 = arith.extf %1 : vector<8x32xbf16> to vector<8x32xf32>
    %119 = arith.addf %118, %117 : vector<8x32xf32>
    %c0_46 = arith.constant 0 : index
    %c0_47 = arith.constant 0 : index
    %120 = vector.load %arg13[%c0_46, %c0_47] : memref<1x32xf32, #tpu.memory_space<vmem>>, vector<1x32xf32>
    %c0_48 = arith.constant 0 : index
    %c0_49 = arith.constant 0 : index
    %121 = vector.load %arg14[%c0_48, %c0_49] : memref<1x32xf32, #tpu.memory_space<vmem>>, vector<1x32xf32>
    %cst_50 = arith.constant dense<0.000000e+00> : vector<8xf32>
    %122 = vector.multi_reduction <add>, %119, %cst_50 [1] : vector<8x32xf32> to vector<8xf32>
    %123 = vector.shape_cast %122 : vector<8xf32> to vector<8x1xf32>
    %cst_51 = arith.constant 3.200000e+01 : f32
    %124 = vector.broadcast %cst_51 : f32 to vector<8x1xf32>
    %125 = arith.divf %123, %124 : vector<8x1xf32>
    %126 = vector.broadcast %125 : vector<8x1xf32> to vector<8x32xf32>
    %127 = arith.subf %119, %126 : vector<8x32xf32>
    %128 = arith.mulf %127, %127 : vector<8x32xf32>
    %cst_52 = arith.constant dense<0.000000e+00> : vector<8xf32>
    %129 = vector.multi_reduction <add>, %128, %cst_52 [1] : vector<8x32xf32> to vector<8xf32>
    %130 = vector.shape_cast %129 : vector<8xf32> to vector<8x1xf32>
    %cst_53 = arith.constant 3.200000e+01 : f32
    %131 = vector.broadcast %cst_53 : f32 to vector<8x1xf32>
    %132 = arith.divf %130, %131 : vector<8x1xf32>
    %133 = vector.broadcast %125 : vector<8x1xf32> to vector<8x32xf32>
    %134 = arith.subf %119, %133 : vector<8x32xf32>
    %cst_54 = arith.constant 9.99999974E-6 : f32
    %135 = vector.broadcast %cst_54 : f32 to vector<8x1xf32>
    %136 = arith.addf %132, %135 : vector<8x1xf32>
    %137 = math.rsqrt %136 : vector<8x1xf32>
    %138 = vector.broadcast %137 : vector<8x1xf32> to vector<8x32xf32>
    %139 = arith.mulf %134, %138 : vector<8x32xf32>
    %140 = vector.broadcast %120 : vector<1x32xf32> to vector<8x32xf32>
    %141 = arith.mulf %139, %140 : vector<8x32xf32>
    %142 = vector.broadcast %121 : vector<1x32xf32> to vector<8x32xf32>
    %143 = arith.addf %141, %142 : vector<8x32xf32>
    %144 = arith.truncf %143 : vector<8x32xf32> to vector<8x32xbf16>
    %c0_55 = arith.constant 0 : index
    %c0_56 = arith.constant 0 : index
    %145 = vector.load %arg15[%c0_55, %c0_56] : memref<32x128xbf16, #tpu.memory_space<vmem>>, vector<32x128xbf16>
    %cst_57 = arith.constant dense<0.000000e+00> : vector<8x128xf32>
    %146 = tpu.matmul %144, %145, %cst_57 {dimension_numbers = #tpu.dot_dimension_numbers<[1], [0], [0], [1], [0, 0, 1, 1], [], []>} : vector<8x32xbf16>, vector<32x128xbf16>, vector<8x128xf32> -> vector<8x128xf32>
    %c0_58 = arith.constant 0 : index
    %c0_59 = arith.constant 0 : index
    %147 = vector.load %arg16[%c0_58, %c0_59] : memref<1x128xf32, #tpu.memory_space<vmem>>, vector<1x128xf32>
    %148 = vector.broadcast %147 : vector<1x128xf32> to vector<8x128xf32>
    %149 = arith.addf %146, %148 : vector<8x128xf32>
    %cst_60 = arith.constant 0.000000e+00 : f32
    %150 = vector.broadcast %cst_60 : f32 to vector<8x128xf32>
    %151 = arith.maximumf %149, %150 : vector<8x128xf32>
    %152 = arith.truncf %151 : vector<8x128xf32> to vector<8x128xbf16>
    %c0_61 = arith.constant 0 : index
    %c0_62 = arith.constant 0 : index
    %153 = vector.load %arg17[%c0_61, %c0_62] : memref<128x32xbf16, #tpu.memory_space<vmem>>, vector<128x32xbf16>
    %cst_63 = arith.constant dense<0.000000e+00> : vector<8x32xf32>
    %154 = tpu.matmul %152, %153, %cst_63 {dimension_numbers = #tpu.dot_dimension_numbers<[1], [0], [0], [1], [0, 0, 1, 1], [], []>} : vector<8x128xbf16>, vector<128x32xbf16>, vector<8x32xf32> -> vector<8x32xf32>
    %c0_64 = arith.constant 0 : index
    %c0_65 = arith.constant 0 : index
    %155 = vector.load %arg18[%c0_64, %c0_65] : memref<1x32xf32, #tpu.memory_space<vmem>>, vector<1x32xf32>
    %156 = vector.broadcast %155 : vector<1x32xf32> to vector<8x32xf32>
    %157 = arith.addf %154, %156 : vector<8x32xf32>
    %158 = arith.addf %143, %157 : vector<8x32xf32>
    %c0_66 = arith.constant 0 : index
    %c0_67 = arith.constant 0 : index
    %159 = vector.load %arg19[%c0_66, %c0_67] : memref<1x32xf32, #tpu.memory_space<vmem>>, vector<1x32xf32>
    %c0_68 = arith.constant 0 : index
    %c0_69 = arith.constant 0 : index
    %160 = vector.load %arg20[%c0_68, %c0_69] : memref<1x32xf32, #tpu.memory_space<vmem>>, vector<1x32xf32>
    %cst_70 = arith.constant dense<0.000000e+00> : vector<8xf32>
    %161 = vector.multi_reduction <add>, %158, %cst_70 [1] : vector<8x32xf32> to vector<8xf32>
    %162 = vector.shape_cast %161 : vector<8xf32> to vector<8x1xf32>
    %cst_71 = arith.constant 3.200000e+01 : f32
    %163 = vector.broadcast %cst_71 : f32 to vector<8x1xf32>
    %164 = arith.divf %162, %163 : vector<8x1xf32>
    %165 = vector.broadcast %164 : vector<8x1xf32> to vector<8x32xf32>
    %166 = arith.subf %158, %165 : vector<8x32xf32>
    %167 = arith.mulf %166, %166 : vector<8x32xf32>
    %cst_72 = arith.constant dense<0.000000e+00> : vector<8xf32>
    %168 = vector.multi_reduction <add>, %167, %cst_72 [1] : vector<8x32xf32> to vector<8xf32>
    %169 = vector.shape_cast %168 : vector<8xf32> to vector<8x1xf32>
    %cst_73 = arith.constant 3.200000e+01 : f32
    %170 = vector.broadcast %cst_73 : f32 to vector<8x1xf32>
    %171 = arith.divf %169, %170 : vector<8x1xf32>
    %172 = vector.broadcast %164 : vector<8x1xf32> to vector<8x32xf32>
    %173 = arith.subf %158, %172 : vector<8x32xf32>
    %cst_74 = arith.constant 9.99999974E-6 : f32
    %174 = vector.broadcast %cst_74 : f32 to vector<8x1xf32>
    %175 = arith.addf %171, %174 : vector<8x1xf32>
    %176 = math.rsqrt %175 : vector<8x1xf32>
    %177 = vector.broadcast %176 : vector<8x1xf32> to vector<8x32xf32>
    %178 = arith.mulf %173, %177 : vector<8x32xf32>
    %179 = vector.broadcast %159 : vector<1x32xf32> to vector<8x32xf32>
    %180 = arith.mulf %178, %179 : vector<8x32xf32>
    %181 = vector.broadcast %160 : vector<1x32xf32> to vector<8x32xf32>
    %182 = arith.addf %180, %181 : vector<8x32xf32>
    %c0_75 = arith.constant 0 : index
    %c0_76 = arith.constant 0 : index
    %c0_77 = arith.constant 0 : index
    %183 = vector.load %arg4[%c0_75, %c0_76, %c0_77] : memref<1x8x32xbf16, #tpu.memory_space<vmem>>, vector<1x8x32xbf16>
    %184 = vector.shape_cast %183 : vector<1x8x32xbf16> to vector<8x32xbf16>
    %185 = arith.extf %184 : vector<8x32xbf16> to vector<8x32xf32>
    %186 = arith.addf %182, %185 : vector<8x32xf32>
    %c0_78 = arith.constant 0 : index
    %c0_79 = arith.constant 0 : index
    %c0_80 = arith.constant 0 : index
    %187 = vector.load %arg21[%c0_78, %c0_79, %c0_80] : memref<1x8x32xf32, #tpu.memory_space<vmem>>, vector<1x8x32xf32>
    %188 = vector.shape_cast %187 : vector<1x8x32xf32> to vector<8x32xf32>
    %189 = vector.shape_cast %186 : vector<8x32xf32> to vector<1x8x32xf32>
    tpu.vector_store %arg21[%c0_78, %c0_79, %c0_80], %189 {strides = array<i32>} : memref<1x8x32xf32, #tpu.memory_space<vmem>>, vector<1x8x32xf32>,
    %cst_81 = arith.constant 2.500000e-01 : f32
    %190 = vector.broadcast %cst_81 : f32 to vector<8x16xf32>
    %191 = arith.mulf %107, %190 : vector<8x16xf32>
    %cst_82 = arith.constant 0.000000e+00 : f32
    %192 = vector.broadcast %cst_82 : f32 to vector<8x112xf32>
    %193 = tpu.concatenate %191, %192 in 1 : vector<8x16xf32>, vector<8x112xf32> -> vector<8x128xf32>
    %c0_83 = arith.constant 0 : index
    %c0_84 = arith.constant 0 : index
    %c0_85 = arith.constant 0 : index
    %194 = vector.load %arg22[%c0_83, %c0_84, %c0_85] : memref<1x8x128xf32, #tpu.memory_space<vmem>>, vector<1x8x128xf32>
    %195 = vector.shape_cast %194 : vector<1x8x128xf32> to vector<8x128xf32>
    %196 = vector.shape_cast %193 : vector<8x128xf32> to vector<1x8x128xf32>
    tpu.vector_store %arg22[%c0_83, %c0_84, %c0_85], %196 {strides = array<i32>} : memref<1x8x128xf32, #tpu.memory_space<vmem>>, vector<1x8x128xf32>,
    return
  }
  func.func @transform_0(%arg0: i32, %arg1: i32) -> (i32, i32, i32) {
    %c0_i32 = arith.constant 0 : i32
    %c0_i32_0 = arith.constant 0 : i32
    return %arg0, %arg1, %c0_i32 : i32, i32, i32
  }
  func.func @transform_1(%arg0: i32, %arg1: i32) -> (i32, i32, i32) {
    %c0_i32 = arith.constant 0 : i32
    %c0_i32_0 = arith.constant 0 : i32
    %c0_i32_1 = arith.constant 0 : i32
    return %arg0, %c0_i32, %c0_i32_0 : i32, i32, i32
  }
  func.func @transform_2(%arg0: i32, %arg1: i32) -> (i32, i32, i32) {
    %c0_i32 = arith.constant 0 : i32
    %c0_i32_0 = arith.constant 0 : i32
    return %arg0, %arg1, %c0_i32 : i32, i32, i32
  }
  func.func @transform_3(%arg0: i32, %arg1: i32) -> (i32, i32) {
    %c0_i32 = arith.constant 0 : i32
    %c0_i32_0 = arith.constant 0 : i32
    %c0_i32_1 = arith.constant 0 : i32
    return %c0_i32, %c0_i32_0 : i32, i32
  }
  func.func @transform_4(%arg0: i32, %arg1: i32) -> (i32, i32) {
    %c0_i32 = arith.constant 0 : i32
    %c0_i32_0 = arith.constant 0 : i32
    %c0_i32_1 = arith.constant 0 : i32
    return %c0_i32, %c0_i32_0 : i32, i32
  }
  func.func @transform_5(%arg0: i32, %arg1: i32) -> (i32, i32) {
    %c0_i32 = arith.constant 0 : i32
    %c0_i32_0 = arith.constant 0 : i32
    %c0_i32_1 = arith.constant 0 : i32
    return %c0_i32, %c0_i32_0 : i32, i32
  }
  func.func @transform_6(%arg0: i32, %arg1: i32) -> (i32, i32) {
    %c0_i32 = arith.constant 0 : i32
    %c0_i32_0 = arith.constant 0 : i32
    %c0_i32_1 = arith.constant 0 : i32
    return %c0_i32, %c0_i32_0 : i32, i32
  }
  func.func @transform_7(%arg0: i32, %arg1: i32) -> (i32, i32) {
    %c0_i32 = arith.constant 0 : i32
    %c0_i32_0 = arith.constant 0 : i32
    %c0_i32_1 = arith.constant 0 : i32
    return %c0_i32, %c0_i32_0 : i32, i32
  }
  func.func @transform_8(%arg0: i32, %arg1: i32) -> (i32, i32) {
    %c0_i32 = arith.constant 0 : i32
    %c0_i32_0 = arith.constant 0 : i32
    %c0_i32_1 = arith.constant 0 : i32
    return %c0_i32, %c0_i32_0 : i32, i32
  }
  func.func @transform_9(%arg0: i32, %arg1: i32) -> (i32, i32) {
    %c0_i32 = arith.constant 0 : i32
    %c0_i32_0 = arith.constant 0 : i32
    %c0_i32_1 = arith.constant 0 : i32
    return %c0_i32, %c0_i32_0 : i32, i32
  }
  func.func @transform_10(%arg0: i32, %arg1: i32) -> (i32, i32) {
    %c0_i32 = arith.constant 0 : i32
    %c0_i32_0 = arith.constant 0 : i32
    %c0_i32_1 = arith.constant 0 : i32
    return %c0_i32, %c0_i32_0 : i32, i32
  }
  func.func @transform_11(%arg0: i32, %arg1: i32) -> (i32, i32) {
    %c0_i32 = arith.constant 0 : i32
    %c0_i32_0 = arith.constant 0 : i32
    %c0_i32_1 = arith.constant 0 : i32
    return %c0_i32, %c0_i32_0 : i32, i32
  }
  func.func @transform_12(%arg0: i32, %arg1: i32) -> (i32, i32) {
    %c0_i32 = arith.constant 0 : i32
    %c0_i32_0 = arith.constant 0 : i32
    %c0_i32_1 = arith.constant 0 : i32
    return %c0_i32, %c0_i32_0 : i32, i32
  }
  func.func @transform_13(%arg0: i32, %arg1: i32) -> (i32, i32) {
    %c0_i32 = arith.constant 0 : i32
    %c0_i32_0 = arith.constant 0 : i32
    %c0_i32_1 = arith.constant 0 : i32
    return %c0_i32, %c0_i32_0 : i32, i32
  }
  func.func @transform_14(%arg0: i32, %arg1: i32) -> (i32, i32) {
    %c0_i32 = arith.constant 0 : i32
    %c0_i32_0 = arith.constant 0 : i32
    %c0_i32_1 = arith.constant 0 : i32
    return %c0_i32, %c0_i32_0 : i32, i32
  }
  func.func @transform_15(%arg0: i32, %arg1: i32) -> (i32, i32) {
    %c0_i32 = arith.constant 0 : i32
    %c0_i32_0 = arith.constant 0 : i32
    %c0_i32_1 = arith.constant 0 : i32
    return %c0_i32, %c0_i32_0 : i32, i32
  }
  func.func @transform_16(%arg0: i32, %arg1: i32) -> (i32, i32) {
    %c0_i32 = arith.constant 0 : i32
    %c0_i32_0 = arith.constant 0 : i32
    %c0_i32_1 = arith.constant 0 : i32
    return %c0_i32, %c0_i32_0 : i32, i32
  }
  func.func @transform_17(%arg0: i32, %arg1: i32) -> (i32, i32) {
    %c0_i32 = arith.constant 0 : i32
    %c0_i32_0 = arith.constant 0 : i32
    %c0_i32_1 = arith.constant 0 : i32
    return %c0_i32, %c0_i32_0 : i32, i32
  }
  func.func @transform_18(%arg0: i32, %arg1: i32) -> (i32, i32) {
    %c0_i32 = arith.constant 0 : i32
    %c0_i32_0 = arith.constant 0 : i32
    %c0_i32_1 = arith.constant 0 : i32
    return %c0_i32, %c0_i32_0 : i32, i32
  }
  func.func @transform_19(%arg0: i32, %arg1: i32) -> (i32, i32, i32) {
    %c0_i32 = arith.constant 0 : i32
    %c0_i32_0 = arith.constant 0 : i32
    return %arg0, %arg1, %c0_i32 : i32, i32, i32
  }
  func.func @transform_20(%arg0: i32, %arg1: i32) -> (i32, i32, i32) {
    %c0_i32 = arith.constant 0 : i32
    %c0_i32_0 = arith.constant 0 : i32
    return %arg0, %arg1, %c0_i32 : i32, i32, i32
  }
}

</mosaic_0001>

<bundles_post_ra>
// kernel: tpu_custom_call.1
= control target key start
LH: loop header
LB: loop body
LE: loop exit
PB: predicated region body
PF: predicated region fallthrough
CT: control target
= control target key end

     0   :  { %s3160_s0 = inlined_call_operand.hbm [shape: bf16[2,8,32], index: 0, kind: input, shape index: {}]   ;;  %s3161_s1 = inlined_call_operand.vmem [shape: bf16[2,16,32], index: 1, kind: input, shape index: {}]   ;;  %s3162_s2 = inlined_call_operand.hbm [shape: bf16[2,8,32], index: 2, kind: input, shape index: {}]   ;;  %s3163_s3 = inlined_call_operand.vmem [shape: bf16[32,32], index: 3, kind: input, shape index: {}]   ;;  %s3164_s4 = inlined_call_operand.vmem [shape: bf16[32,32], index: 4, kind: input, shape index: {}]   ;;  %s3165_s5 = inlined_call_operand.vmem [shape: bf16[32,32], index: 5, kind: input, shape index: {}]   ;;  %s3166_s6 = inlined_call_operand.vmem [shape: f32[1,32], index: 6, kind: input, shape index: {}]   ;;  %s3167_s7 = inlined_call_operand.vmem [shape: f32[1,32], index: 7, kind: input, shape index: {}]   ;;  %s3168_s8 = inlined_call_operand.vmem [shape: f32[1,32], index: 8, kind: input, shape index: {}]   ;;  %s3169_s9 = inlined_call_operand.vmem [shape: bf16[32,32], index: 9, kind: input, shape index: {}]   ;;  %s3170_s10 = inlined_call_operand.vmem [shape: f32[1,32], index: 10, kind: input, shape index: {}]   ;;  %s3171_s11 = inlined_call_operand.vmem [shape: f32[1,32], index: 11, kind: input, shape index: {}]   ;;  %s3172_s12 = inlined_call_operand.vmem [shape: f32[1,32], index: 12, kind: input, shape index: {}]   ;;  %s3173_s13 = inlined_call_operand.hbm [shape: bf16[32,128], index: 13, kind: input, shape index: {}]   ;;  %s3174_s14 = inlined_call_operand.vmem [shape: f32[1,128], index: 14, kind: input, shape index: {}]   ;;  %s3175_s15 = inlined_call_operand.vmem [shape: bf16[128,32], index: 15, kind: input, shape index: {}]   ;;  %s3176_s16 = inlined_call_operand.vmem [shape: f32[1,32], index: 16, kind: input, shape index: {}]   ;;  %s3177_s17 = inlined_call_operand.vmem [shape: f32[1,32], index: 17, kind: input, shape index: {}]   ;;  %s3178_s18 = inlined_call_operand.vmem [shape: f32[1,32], index: 18, kind: input, shape index: {}]   ;;  %s3179_s19 = inlined_call_operand.hbm [shape: f32[2,8,32], index: 19, kind: output, shape index: {0}]   ;;  %s3180_s20 = inlined_call_operand.hbm [shape: f32[2,8,128], index: 20, kind: output, shape index: {1}]  }
   0x1   :  { %3192 = sst [smem:[#allocation22_spill]] %s3160_s0 }
   0x2   :  { %3193 = sst [smem:[#allocation23_spill]] %s3161_s1 }
   0x3   :  { %3194 = sst [smem:[#allocation24_spill]] %s3162_s2 }
   0x4   :  { %3195 = sst [smem:[#allocation25_spill]] %s3163_s3 }
   0x5   :  { %3196 = sst [smem:[#allocation26_spill]] %s3164_s4 }
   0x6   :  { %3197 = sst [smem:[#allocation27_spill]] %s3171_s11 }
   0x7   :  { %3198 = sst [smem:[#allocation28_spill]] %s3172_s12 }
   0x8   :  { %3199 = sst [smem:[#allocation29_spill]] %s3173_s13 }
   0x9   :  { %3200 = sst [smem:[#allocation30_spill]] %s3174_s14 }
   0xa   :  { %3201 = sst [smem:[#allocation31_spill]] %s3176_s16 }
   0xb   :  { %3202 = sst [smem:[#allocation32_spill]] %s3177_s17 }
   0xc   :  { %3203 = sst [smem:[#allocation33_spill]] %s3178_s18 }
   0xd   :  { %3204 = sst [smem:[#allocation34_spill]] %s3179_s19 }
   0xe   :  { %3205 = sst [smem:[#allocation35_spill]] %s3180_s20 }
   0xf   :  { %26 = vsyncpa [#allocation3], 0 }
  0x10   :  { %28 = vsyncpa [#allocation3 + $0x1], 0 }
  0x11   :  { %29 = vsyncpa [#allocation6], 0 }
  0x12   :  { %31 = vsyncpa [#allocation6 + $0x1], 0 }
  0x13   :  { %32 = vsyncpa [#allocation4], 0 }
  0x14   :  { %34 = vsyncpa [#allocation4 + $0x1], 0 }
  0x15   :  { %35 = vsyncpa [#allocation10], 0 }
  0x16   :  { %37 = vsyncpa [#allocation10 + $0x1], 0  ;;  %s2720_s1 = smov 0   ;;  %s2722_s22 = smov 0  }
  0x17   :  { %s2724_s23 = smov 0   ;;  %s2726_s24 = smov 0  }
  0x18   :  { %s2728_s2 = smov 0   ;;  %s2730_s25 = smov 0  }
  0x19 LB: > { %3206 = sst [smem:[#allocation16_spill]] %s2581_s1  ;;  %s2751_s3 = sadd.s32 4294967295, %s2601_s25   ;;  %s2601_s25 = sphi %s2730_s25, %s43_s25   ;;  %s2597_s2 = sphi %s2728_s2, %s3242_s2   ;;  %s2593_s24 = sphi %s2726_s24, %s3241_s24   ;;  %s2589_s23 = sphi %s2724_s23, %s3245_s23   ;;  %s2585_s22 = sphi %s2722_s22, %s3244_s22   ;;  %s2581_s1 = sphi %s2720_s1, %s3243_s1  }
  0x1a   : > { %3207 = sst [smem:[#allocation17_spill]] %s2597_s2  ;;  %s2039_s26 = sadd.s32 4294967294, %s2601_s25  }
  0x1b   : > { %p77_p0 = scmp.ne.s32.totalorder %s2585_s22, %s2581_s1  ;;  %p78_p1 = scmp.eq.s32.totalorder %s2751_s3, 0 }
  0x1c   : > { %p499_p3 = scmp.eq.s32.totalorder %s2039_s26, 1  ;;  %p2040_p5 = scmp.ge.s32.totalorder %s2601_s25, 1 }
  0x1d   : > { %p2760_p4 = por %p78_p1, %p77_p0  ;;  %p534_p7 = scmp.lt.s32.totalorder %s2601_s25, 3 }
  0x1e   : > { %p2765_p6 = por %p499_p3, %p77_p0  ;;  %s2603_s29 = smov [#allocation7]  }
  0x1f   : > { %p2770_p8 = pnand %p2040_p5, %p534_p7  ;;  %s576_s30 = sshll.u32 %s2603_s29, 4  ;;  %s577_s30 = int_to_ptr.vmem [resolvable:$true] %s576_s30 }
  0x20   : > { %s3209_s28 = scalar_select %p2765_p6, 1, 0 }
  0x21   : > { %p2286_p9 = pneg %p2770_p8  ;;  %s55_s21 = sadd.s32 1, %s2597_s2 }
  0x22   : > { %3210 = sst [smem:[#allocation18_spill]] %s3209_s28  ;;  %s2412_s26 = scalar_lea.vmem %s577_s30, 256 }
  0x23   : > { %p2779_p11 = pnand %p2286_p9, %p78_p1  ;;  %p2413_p13 = scmp.ne.s32.totalorder %s577_s30, %s2412_s26 }
  0x24   : > { %p2420_p5 = scmp.lt.s32.totalorder %s577_s30, %s577_s30  ;;  %p2421_p7 = scmp.lt.s32.totalorder %s2412_s26, %s2412_s26 }
  0x25   : > { %p2403_p12 = pneg %p2779_p11 }
  0x26   : > { %p2422_p2 = por %p2421_p7, %p2420_p5 }
  0x27   : > { %p2415_p0 = pnand %p2413_p13, %p2403_p12 }
  0x29   : > { %p2416_p3 = pneg %p2415_p0 }
  0x2b   : > { %p2423_p6 = pnand %p2422_p2, %p2416_p3 }
  0x2d   : > { %2426 = shalt.err (!%p2423_p6)
}
  0x2e   : > { %s2604_s29 = smov 64   ;;  %s2605_s28 = smov 4  }
  0x2f   : > { %s3213_s13 = sld [smem:[#allocation29_spill]]  ;;  %p57_p2 = scmp.ge.s32.totalorder %s55_s21, 2 }
  0x30   : > { %s64_s26 = sadd.s32 1, %s2589_s23  ;;  %p71_p6 = scmp.ne.s32.totalorder %s2589_s23, %s2585_s22 }
  0x31   : > { %p72_p9 = scmp.eq.s32.totalorder %s2601_s25, 0  ;;  %s3247_s21 = smov (%p57_p2, %s55_s21), 0 }
  0x32   : > { %3214 = sst [smem:[#allocation19_spill]] %s3247_s21  ;;  %p3216_p13 = scmp.eq.s32.totalorder %s2751_s3, 1 }
  0x33   : > { %p2797_p12 = por %p72_p9, %p71_p6  ;;  %s59_s19 = ssub.s32 %s2597_s2, %s3247_s21 }
  0x34   : > { %p2803_p0 = por %p3216_p13, %p71_p6  ;;  %p62_p3 = scmp.eq.s32.totalorder %s59_s19, 0 }
  0x35   : > { %2289 = dma.hbm_to_vmem [thread:$0]  (!%p2779_p11), %s3213_s13, 256, %s577_s30, [#allocation6], %s2604_s29, %s2604_s29, %s2605_s28  }
  0x36   : > { %s3217_s0 = scalar_select %p2803_p0, 1, 0 }
  0x37   : > { %p2305_p11 = scmp.lt.s32.totalorder %s2601_s25, 2  ;;  %s605_s1 = sand.u32 1, %s2589_s23  }
  0x38   : > { %3218 = sst [smem:[#allocation20_spill]] %s3217_s0  ;;  %s2043_s28 = sshll.u32 %s605_s1, 2 }
  0x39   : > { %s2812_s30 = scalar_select %p62_p3, %s2589_s23, %s64_s26  }
  0x3a   : > { %s2044_s29 = sshll.u32 %s2597_s2, 6  ;;  %s3220_s20 = sld [smem:[#allocation22_spill]] }
  0x3b   : > { %3219 = sst [smem:[#allocation21_spill]] %s2812_s30  ;;  %s609_s14 = scalar_lea.vmem [#allocation2], %s2043_s28 }
  0x3c   : > { %s617_s12 = sshll.u32 %s609_s14, 4  ;;  %p2820_p5 = pnand %p2305_p11, %p2797_p12  ;;  %s618_s12 = int_to_ptr.vmem [resolvable:$true] %s617_s12 }
  0x3d   : > { %s3222_s19 = sld [smem:[#allocation24_spill]]  ;;  %s632_s2 = sand.u32 1, %s2601_s25  }
  0x3e   : > { %s606_s30 = scalar_lea.sflag [#allocation3], %s605_s1  ;;  %p2429_p7 = pneg %p2820_p5 }
  0x3f   : > { %s2440_s13 = scalar_lea.vmem %s618_s12, 64  ;;  %s2606_s14 = smov [#allocation2]  }
  0x40   : > { %s615_s16 = scalar_lea.hbm %s3220_s20, %s2044_s29  ;;  %p2441_p2 = scmp.ne.s32.totalorder %s618_s12, %s2440_s13 }
  0x41   : > { %s2445_s17 = sshll.u32 %s2606_s14, 4  ;;  %s2446_s17 = int_to_ptr.vmem [resolvable:$false] %s2445_s17 }
  0x42   : > { %p2443_p6 = pnand %p2441_p2, %p2429_p7  ;;  %s2447_s18 = scalar_lea.vmem %s2446_s17, 128 }
  0x43   : > { %s2827_s26 = scalar_lea.hbm %s3222_s19, %s2044_s29  ;;  %p2448_p12 = scmp.lt.s32.totalorder %s618_s12, %s2446_s17 }
  0x44   : > { %p2444_p9 = pneg %p2443_p6  ;;  %p2449_p13 = scmp.lt.s32.totalorder %s2447_s18, %s2440_s13 }
  0x46   : > { %p2450_p11 = por %p2449_p13, %p2448_p12 }
  0x48   : > { %p2451_p3 = pnand %p2450_p11, %p2444_p9 }
  0x4a   : > { %2454 = shalt.err (!%p2451_p3)
}
  0x4b   : > { %2293 = dma.hbm_to_vmem [thread:$0]  (!%p2820_p5), %s615_s16, 64, %s618_s12, %s606_s30  }
  0x4c   : > { %s636_s20 = scalar_lea.vmem [#allocation5], %s2043_s28  ;;  %s633_s0 = scalar_lea.sflag [#allocation6], %s632_s2 }
  0x4d   : > { %s644_s21 = sshll.u32 %s636_s20, 4  ;;  %s2607_s29 = smov [#allocation5]   ;;  %s645_s21 = int_to_ptr.vmem [resolvable:$true] %s644_s21 }
  0x4e   : > { %s2468_s1 = scalar_lea.vmem %s645_s21, 64  ;;  %s2473_s19 = sshll.u32 %s2607_s29, 4  ;;  %s2474_s19 = int_to_ptr.vmem [resolvable:$false] %s2473_s19 }
  0x4f   : > { %p2469_p2 = scmp.ne.s32.totalorder %s645_s21, %s2468_s1  ;;  %s2475_s13 = scalar_lea.vmem %s2474_s19, 128 }
  0x50   : > { %p2476_p9 = scmp.lt.s32.totalorder %s645_s21, %s2474_s19  ;;  %p2477_p12 = scmp.lt.s32.totalorder %s2475_s13, %s2468_s1 }
  0x51   : > { %p2471_p6 = pnand %p2469_p2, %p2429_p7 }
  0x52   : > { %p2478_p13 = por %p2477_p12, %p2476_p9 }
  0x53   : > { %p2472_p10 = pneg %p2471_p6 }
  0x55   : > { %p2479_p11 = pnand %p2478_p13, %p2472_p10 }
  0x57   : > { %2482 = shalt.err (!%p2479_p11)
}
  0x58   : > { %2296 = dma.hbm_to_vmem [thread:$0]  (!%p2820_p5), %s2827_s26, 64, %s645_s21, %s633_s0  }
  0x59   : > { %653 = sbr.rel (%p2770_p8) target bundleno = 3601 (0xe11), region = 96  ;;  %s2846_s12 = sand.u32 (!%p2770_p8), 1, %s2585_s22  }
  0x5a   : > { %s2048_s16 = sshll.u32 (!%p2770_p8), %s2846_s12, 2  ;;  %s656_s2 = scalar_lea.sflag (!%p2770_p8), [#allocation3], %s2846_s12 }
  0x5b   : > { %s659_s28 = scalar_lea.vmem (!%p2770_p8), [#allocation2], %s2048_s16 }
  0x5e   : > { %2560 = dma.done.wait (%p2760_p4), %s656_s2, 64  }
  0x5f   : > { %2562 = vsyncadd (%p2760_p4), %s656_s2, 4294967232  ;;  %s664_s11 = sand.u32 1, %s2751_s3   ;;  %s2855_s4 = scalar_lea.vmem [#allocation5], %s2048_s16 }
  0x60   : > { %s665_s30 = scalar_lea.sflag [#allocation6], %s664_s11 }
  0x61   : > { %2564 = dma.done.wait (%p2760_p4), %s665_s30, 64  }
  0x62   : > { %2566 = vsyncadd (%p2760_p4), %s665_s30, 4294967232 }
  0x63   : > { %2568 = dma.done.wait (%p78_p1), [#allocation6], 256  }
  0x64   : > { %2570 = vsyncadd (%p78_p1), [#allocation6], 4294967040  ;;  %p744_p8 = scmp.lt.s32.totalorder %s2593_s24, 1  ;;  %v2608_v0 = vmov 0.0   ;;  %vm2609_vm0 = vmmov 0   ;;  %s3223_s3 = sld [smem:[#allocation25_spill]] }
  0x65   : > { %2150 = vmatprep.subr.bf16.mxu1 %v2608_v0  ;;  %2154 = vmatprep.mubr.msk.bf16.mxu1 %vm2609_vm0, %v2608_v0  ;;  %s3224_s1 = sld [smem:[#allocation23_spill]]  ;;  %v2883_v3 = vld [vmem:[%s659_s28] sm:$0xf]  ;;  %vm776_vm1 = vcmask 261120   ;;  %v2369_v7 = vld [vmem:[%s3165_s5 + $0x8] sm:$0xff]   ;;  %vm964_vm2 = vcmask 64512  }
  0x66   : > { %2180 = vmatprep.subr.bf16.mxu0 %v2608_v0  ;;  %2182 = vmatprep.mubr.msk.bf16.mxu0 %vm2609_vm0, %v2608_v0  ;;  %s745_s27 = scalar_select %p744_p8, %s2593_s24, 1  ;;  %v2370_v8 = vld [vmem:[%s3165_s5] sm:$0xff]   ;;  %vm1011_vm3 = vcmask 130048   ;;  %vm1185_vm4 = vcmask 1043456  }
  0x67   : > { %s3225_s16 = sld [smem:[#allocation26_spill]]  ;;  %v2055_v13 = vld [vmem:[%s3166_s6] ss:$0 sm:$0xff]  ;;  %s2610_s21 = smov 120   ;;  %v961_v61 = vld [vmem:[%s3169_s9 + $0x4] sm:$0xf] }
  0x68   : > { %s2104_s17 = sshll.u32 %s745_s27, 3  ;;  %v2059_v15 = vld [vmem:[%s3167_s7] ss:$0 sm:$0xff]  ;;  %v1187_v62 = vsel %vm1185_vm4, %v961_v61, 0  ;;  %s2612_s28 = smov 104  }
  0x69   : > { %v2064_v26 = vld [vmem:[%s3168_s8] ss:$0 sm:$0xff]  ;;  %s3226_s0 = sld [smem:[#allocation27_spill]]  ;;  %s2613_s27 = smov [#allocation9]  }
  0x6a   : > { %v2364_v1 = vld [vmem:[%s3223_s3 + $0x8] sm:$0xff]   ;;  %v2365_v2 = vld [vmem:[%s3223_s3] sm:$0xff]   ;;  %s3227_s19 = sld [smem:[#allocation28_spill]] }
  0x6b   : > { %2151 = vmatpush3.bf16.msra.mxu1 %v2364_v1  ;;  %s748_s29 = scalar_lea.vmem %s3224_s1, %s2104_s17  ;;  %s2051_s17 = sshll.u32 %s2846_s12, 3 }
  0x6c   : > { %2152 = vmatprep.subr.bf16.mxu1 %v2608_v0  ;;  %v2368_v6 = vld [vmem:[%s748_s29] sm:$0xff]   ;;  %s2611_s29 = smov 112   ;;  %s3030_s18 = scalar_lea.vmem [#allocation9], %s2051_s17 }
  0x6d   : > { %v2366_v4 = vld [vmem:[%s3225_s16 + $0x8] sm:$0xff]   ;;  %v2367_v5 = vld [vmem:[%s3225_s16] sm:$0xff]   ;;  %s3228_s26 = sld [smem:[#allocation30_spill]]  ;;  %s3191_s1 = sshll.u32 %s2593_s24, 7 }
  0x6e   : > { %s3231_s13 = sld [smem:[#allocation35_spill]]  ;;  %s1880_s11 = sshll.u32 %s3030_s18, 4  ;;  %s1881_s11 = int_to_ptr.vmem [resolvable:$true] %s1880_s11 }
  0x6f   : > { %2153 = vmatpush3.bf16.msra.mxu1 %v2365_v2  ;;  %s2483_s30 = scalar_lea.vmem %s1881_s11, 128 }
  0x70   : > { %2158 = vmatprep.subr.bf16.mxu1 %v2608_v0  ;;  %p2484_p1 = scmp.ne.s32.totalorder %s1881_s11, %s2483_s30 }
  0x72   : > { %2155 = vmatmul.mubr.msk.bf16.vlgmr.msra.gmra.mxu1 %vm776_vm1, %v2883_v3  ;;  %p2485_p4 = pnand %p2484_p1, %p2803_p0 }
  0x73   : > { %2159 = vmatpush3.bf16.msra.mxu1 %v2366_v4  ;;  %2162 = vmatprep.mubr.msk.bf16.mxu1 %vm2609_vm0, %v2608_v0  ;;  %v960_v4 = vld [vmem:[%s3169_s9] sm:$0xf] }
  0x74   : > { %2160 = vmatprep.subr.bf16.mxu1 %v2608_v0  ;;  %s1878_s2 = scalar_lea.hbm %s3231_s13, %s3191_s1  ;;  %p2486_p10 = pneg %p2485_p4 }
  0x77   : > { %2161 = vmatpush3.bf16.msra.mxu1 %v2367_v5 }
  0x78   : > { %2166 = vmatprep.subr.bf16.mxu1 %v2608_v0 }
  0x7a   : > { %2163 = vmatmul.mubr.msk.bf16.vlgmr.msra.gmra.mxu1 %vm776_vm1, %v2368_v6 }
  0x7b   : > { %2170 = vmatprep.mubr.msk.bf16.mxu1 %vm2609_vm0, %v2608_v0  ;;  %2167 = vmatpush3.bf16.msra.mxu1 %v2369_v7  ;;  %v1233_v7 = vsel %vm1185_vm4, %v960_v4, 0 }
  0x7c   : > { %2168 = vmatprep.subr.bf16.mxu1 %v2608_v0 }
  0x7f   : > { %2169 = vmatpush3.bf16.msra.mxu1 %v2370_v8 }
  0x80   : > { %2174 = vmatprep.subr.bf16.mxu1 %v2608_v0 }
  0x82   : > { %2171 = vmatmul.mubr.msk.bf16.vlgmr.msra.gmra.mxu1 %vm776_vm1, %v2368_v6 }
  0x83   : > { %2176 = vmatprep.mubr.msk.bf16.mxu1 %vm2609_vm0, %v2608_v0 }
 0x132   : > { %v814_v9 = vpop.f32.mrf.mxu1 }
 0x133   : > { %v815_v17 = vadd.f32 %v2055_v13, %v814_v9 }
 0x134   : > { %v2156_v10 = vpop.f32.mrf.mxu1 }
 0x135   : > { %v956_v22 = vmul.f32 0.35355338, %v815_v17 }
 0x136   : > { %v817_v11 = vpop.f32.mrf.mxu1 }
 0x137   : > { %v2924_v25 = vpack.c.bf16 %v956_v22, %v956_v22 }
 0x138   : > { %v2157_v12 = vpop.f32.mrf.mxu1 }
 0x13a   : > { %v885_v14 = vpop.f32.mrf.mxu1 }
 0x13b   : > { %v886_v19 = vadd.f32 %v2059_v15, %v885_v14 }
 0x13c   : > { %v2164_v16 = vpop.f32.mrf.mxu1 }
 0x13e   : > { %v888_v18 = vpop.f32.mrf.mxu1 }
 0x13f   : > { %v889_v20 = vadd.f32 %v2059_v15, %v888_v18 }
 0x140   : > { %v2165_v21 = vpop.f32.mrf.mxu1 }
 0x141   : > { %v2918_v23 = vpack.c.bf16 %v889_v20, %v886_v19 }
 0x142   : > { %v949_v27 = vpop.f32.mrf.mxu1 }
 0x143   : > { %1073 = vrot.lane.b32.xlu0 %v2918_v23, %s2610_s21  ;;  %v969_v24 = vsel %vm964_vm2, %v2918_v23, 0  ;;  %v950_v29 = vadd.f32 %v2064_v26, %v949_v27 }
 0x144   : > { %2175 = vmatpush3.bf16.xpose.msra.mxu1 %v969_v24  ;;  %v2172_v28 = vpop.f32.mrf.mxu1 }
 0x145   : > { %2186 = vmatprep.subr.bf16.mxu1 %v2608_v0 }
 0x146   : > { %v952_v30 = vpop.f32.mrf.mxu1 }
 0x147   : > { %1070 = vrot.lane.b32.xlu0 %v2924_v25, %s2610_s21  ;;  %v953_v31 = vadd.f32 %v2064_v26, %v952_v30 }
 0x148   : > { %v2173_v32 = vpop.f32.mrf.mxu1 }
 0x149   : > { %v2936_v33 = vpack.c.bf16 %v953_v31, %v950_v29 }
 0x14b   : > { %2177 = vmatmul.mubr.msk.bf16.vlgmr.msra.gmra.mxu1 %vm964_vm2, %v2924_v25  ;;  %2181 = vmatpush3.bf16.msra.mxu0 %v2936_v33 }
 0x14c   : > { %2188 = vmatprep.mubr.msk.bf16.mxu1 %vm2609_vm0, %v2608_v0  ;;  %2192 = vmatprep.subr.bf16.mxu0 %v2608_v0 }
 0x1b5   : > { %v1074_v34 = vpop.permute.xlu0 %1073 }
 0x1b6   : > { %v1079_v35 = vsel %vm964_vm2, %v1074_v34, 0 }
 0x1b7   : > { %2187 = vmatpush3.bf16.xpose.msra.mxu1 %v1079_v35 }
 0x1b8   : > { %2198 = vmatprep.subr.bf16.mxu1 %v2608_v0 }
 0x1b9   : > { %v1071_v36 = vpop.permute.xlu0 %1070 }
 0x1be   : > { %2189 = vmatmul.mubr.msk.bf16.vlgmr.msra.gmra.mxu1 %vm964_vm2, %v1071_v36 }
 0x1bf   : > { %2200 = vmatprep.mubr.msk.bf16.mxu1 %vm2609_vm0, %v2608_v0  ;;  %2199 = vmatpush3.bf16.msra.mxu1 %v1187_v62 }
 0x1c0   : > { %2210 = vmatprep.subr.bf16.mxu1 %v2608_v0 }
 0x20b   : > { %v1005_v37 = vpop.f32.mrf.mxu1 }
 0x20c   : > { %v1012_v38 = vsel %vm1011_vm3, %v1005_v37, -inf }
 0x20d   : > { %1013 = vmax.xlane.f32.xlu1 %v1012_v38  ;;  %v2178_v39 = vpop.f32.mrf.mxu1 }
 0x20f   : > { %v1008_v40 = vpop.f32.mrf.mxu1 }
 0x211   : > { %v2179_v41 = vpop.f32.mrf.mxu1 }
 0x27e   : > { %v1115_v42 = vpop.f32.mrf.mxu1 }
 0x27f   : > { %v1121_v43 = vsel %vm1011_vm3, %v1115_v42, -inf }
 0x280   : > { %1122 = vmax.xlane.f32.xlu1 %v1121_v43  ;;  %v2190_v44 = vpop.f32.mrf.mxu1 }
 0x282   : > { %v1118_v45 = vpop.f32.mrf.mxu1 }
 0x284   : > { %v2191_v46 = vpop.f32.mrf.mxu1 }
 0x296   : > { %v1014_v47 = vpop.xlane.xlu1 %1013 }
 0x297   : > { %v1015_v48 = vsub.f32 %v1005_v37, %v1014_v47 }
 0x299   : > { %v1016_v49 = vmul.f32 1.442695, %v1015_v48 }
 0x29b   : > { %2381 = vpow2.f32 %v1016_v49 }
 0x2a8   : > { %v2382_v50 = vpop.eup %2381 }
 0x2a9   : > { %v1018_v51 = vsel %vm1011_vm3, %v2382_v50, 0.0 }
 0x2aa   : > { %1019 = vadd.xlane.f32.xlu0 %v1018_v51 }
 0x2c0   : > { %1338 = vrot.lane.b32.xlu0 %v2936_v33, %s2611_s29 }
 0x309   : > { %v1123_v52 = vpop.xlane.xlu1 %1122 }
 0x30a   : > { %v1124_v53 = vsub.f32 %v1115_v42, %v1123_v52 }
 0x30c   : > { %v1125_v54 = vmul.f32 1.442695, %v1124_v53 }
 0x30e   : > { %2383 = vpow2.f32 %v1125_v54 }
 0x31b   : > { %v2384_v55 = vpop.eup %2383 }
 0x31c   : > { %v1127_v56 = vsel %vm1011_vm3, %v2384_v55, 0.0 }
 0x31d   : > { %1128 = vadd.xlane.f32.xlu1 %v1127_v56 }
 0x32e   : > { %1135 = vrot.lane.b32.xlu1 %v2936_v33, %s2610_s21  ;;  %s3229_s21 = sld [smem:[#allocation31_spill]] }
 0x332   : > { %1277 = vrot.lane.b32.xlu1 %v2918_v23, %s2611_s29 }
 0x333   : > { %v1020_v57 = vpop.xlane.xlu0 %1019 }
 0x334   : > { %2385 = vrcp.f32 %v1020_v57 }
 0x336   : > { %1275 = vrot.lane.b32.xlu1 %v2924_v25, %s2611_s29 }
 0x337   : > { %v1339_v11 = vpop.permute.xlu0 %1338 }
 0x341   : > { %v2386_v58 = vpop.eup %2385 }
 0x342   : > { %v2954_v59 = vmul.f32 %v2386_v58, %v2382_v50 }
 0x344   : > { %v1024_v60 = vpack.c.bf16 %v2954_v59, %v2954_v59 }
 0x346   : > { %2183 = vmatmul.mubr.msk.bf16.vlgmr.msra.gmra.mxu0 %vm1011_vm3, %v1024_v60 }
 0x347   : > { %2194 = vmatprep.mubr.msk.bf16.mxu0 %vm2609_vm0, %v2608_v0 }
 0x3a6   : > { %v1129_v63 = vpop.xlane.xlu1 %1128 }
 0x3a7   : > { %2387 = vrcp.f32 %v1129_v63 }
 0x3aa   : > { %v1136_v1 = vpop.permute.xlu1 %1135 }
 0x3ab   : > { %2193 = vmatpush3.bf16.msra.mxu0 %v1136_v1 }
 0x3ac   : > { %2204 = vmatprep.subr.bf16.mxu0 %v2608_v0 }
 0x3ae   : > { %v1278_v14 = vpop.permute.xlu1 %1277 }
 0x3af   : > { %v1283_v18 = vsel %vm964_vm2, %v1278_v14, 0 }
 0x3b2   : > { %v1276_v21 = vpop.permute.xlu1 %1275 }
 0x3b4   : > { %v2388_v2 = vpop.eup %2387 }
 0x3b5   : > { %v1131_v5 = vmul.f32 %v2388_v2, %v2384_v55 }
 0x3b7   : > { %v1133_v6 = vpack.c.bf16 %v1131_v5, %v1131_v5  ;;  %v1132_v46 = vadd.f32 %v1131_v5, %v2954_v59 }
 0x3b9   : > { %2195 = vmatmul.mubr.msk.bf16.vlgmr.msra.gmra.mxu0 %vm1011_vm3, %v1133_v6 }
 0x3ba   : > { %2205 = vmatpush3.bf16.msra.mxu0 %v1233_v7  ;;  %2206 = vmatprep.mubr.msk.bf16.mxu0 %vm2609_vm0, %v2608_v0  ;;  %v963_v7 = vld [vmem:[%s3169_s9 + $0xc] sm:$0xf] }
 0x3bb   : > { %2216 = vmatprep.subr.bf16.mxu0 %v2608_v0 }
 0x406   : > { %v1062_v8 = vpop.f32.mrf.mxu0 }
 0x407   : > { %v1068_v9 = vpack.c.bf16 %v1062_v8, %v1062_v8 }
 0x408   : > { %v2184_v10 = vpop.f32.mrf.mxu0 }
 0x409   : > { %2207 = vmatmul.mubr.msk.bf16.vlgmr.msra.gmra.mxu0 %vm964_vm2, %v1068_v9  ;;  %v1546_v9 = vsel %vm1185_vm4, %v963_v7, 0 }
 0x40a   : > { %2217 = vmatpush3.bf16.msra.mxu0 %v1339_v11  ;;  %v1065_v12 = vpop.f32.mrf.mxu0  ;;  %2218 = vmatprep.mubr.msk.bf16.mxu0 %vm2609_vm0, %v2608_v0 }
 0x40b   : > { %2228 = vmatprep.subr.bf16.mxu0 %v2608_v0 }
 0x40c   : > { %v2185_v13 = vpop.f32.mrf.mxu0 }
 0x479   : > { %v1175_v15 = vpop.f32.mrf.mxu0 }
 0x47a   : > { %v1181_v16 = vpack.c.bf16 %v1175_v15, %v1175_v15 }
 0x47b   : > { %v2196_v17 = vpop.f32.mrf.mxu0 }
 0x47c   : > { %2201 = vmatmul.mubr.msk.bf16.vlgmr.msra.gmra.mxu1 %vm964_vm2, %v1181_v16 }
 0x47d   : > { %2211 = vmatpush3.bf16.xpose.msra.mxu1 %v1283_v18  ;;  %v1178_v19 = vpop.f32.mrf.mxu0  ;;  %2212 = vmatprep.mubr.msk.bf16.mxu1 %vm2609_vm0, %v2608_v0 }
 0x47e   : > { %2222 = vmatprep.subr.bf16.mxu1 %v2608_v0 }
 0x47f   : > { %v2197_v20 = vpop.f32.mrf.mxu0 }
 0x484   : > { %2213 = vmatmul.mubr.msk.bf16.vlgmr.msra.gmra.mxu1 %vm964_vm2, %v1276_v21 }
 0x485   : > { %2224 = vmatprep.mubr.msk.bf16.mxu1 %vm2609_vm0, %v2608_v0 }
 0x4c9   : > { %v2987_v22 = vpop.f32.mrf.mxu0 }
 0x4cb   : > { %v2208_v24 = vpop.f32.mrf.mxu0 }
 0x4cd   : > { %v1272_v26 = vpop.f32.mrf.mxu0 }
 0x4cf   : > { %v2209_v27 = vpop.f32.mrf.mxu0 }
 0x53c   : > { %v1223_v28 = vpop.f32.mrf.mxu1 }
 0x53d   : > { %v1270_v5 = vadd.f32 %v2987_v22, %v1223_v28  ;;  %v2080_v28 = vld [vmem:[%s3170_s10] ss:$0 sm:$0xff] }
 0x53e   : > { %v2202_v29 = vpop.f32.mrf.mxu1 }
 0x540   : > { %v1226_v30 = vpop.f32.mrf.mxu1 }
 0x541   : > { %v1597_v30 = vunpack.c.l.bf16 %v2883_v3  ;;  %v2373_v3 = vld [vmem:[%s3175_s15 + $0x38] sm:$0xff]  }
 0x542   : > { %v2203_v31 = vpop.f32.mrf.mxu1 }
 0x544   : > { %v1319_v32 = vpop.f32.mrf.mxu1 }
 0x545   : > { %v1325_v34 = vsel %vm1011_vm3, %v1319_v32, -inf }
 0x546   : > { %1326 = vmax.xlane.f32.xlu1 %v1325_v34  ;;  %v2214_v35 = vpop.f32.mrf.mxu1 }
 0x548   : > { %v1322_v36 = vpop.f32.mrf.mxu1 }
 0x54a   : > { %v2215_v37 = vpop.f32.mrf.mxu1 }
 0x5cf   : > { %v1327_v38 = vpop.xlane.xlu1 %1326 }
 0x5d0   : > { %v1328_v39 = vsub.f32 %v1319_v32, %v1327_v38 }
 0x5d2   : > { %v1329_v40 = vmul.f32 1.442695, %v1328_v39 }
 0x5d4   : > { %2389 = vpow2.f32 %v1329_v40 }
 0x5e1   : > { %v2390_v41 = vpop.eup %2389 }
 0x5e2   : > { %v1331_v42 = vsel %vm1011_vm3, %v2390_v41, 0.0 }
 0x5e3   : > { %1332 = vadd.xlane.f32.xlu0 %v1331_v42 }
 0x5f9   : > { %1434 = vrot.lane.b32.xlu0 %v2918_v23, %s2612_s28 }
 0x5fd   : > { %1432 = vrot.lane.b32.xlu0 %v2924_v25, %s2612_s28  ;;  %v962_v25 = vld [vmem:[%s3169_s9 + $0x8] sm:$0xf] }
 0x5fe   : > { %v1389_v51 = vsel %vm1185_vm4, %v962_v25, 0 }
 0x5ff   : > { %2223 = vmatpush3.bf16.msra.mxu1 %v1389_v51 }
 0x600   : > { %2234 = vmatprep.subr.bf16.mxu1 %v2608_v0 }
 0x66c   : > { %v1333_v43 = vpop.xlane.xlu0 %1332 }
 0x66d   : > { %2391 = vrcp.f32 %v1333_v43  ;;  %v2371_v43 = vld [vmem:[#allocation7 + $0x8] sm:$0xff]  }
 0x670   : > { %v1435_v47 = vpop.permute.xlu0 %1434 }
 0x671   : > { %v1440_v50 = vsel %vm964_vm2, %v1435_v47, 0  ;;  %v2376_v47 = vld [vmem:[%s3175_s15 + $0x20] sm:$0xff]  }
 0x674   : > { %v1433_v23 = vpop.permute.xlu0 %1432 }
 0x67a   : > { %v2392_v44 = vpop.eup %2391 }
 0x67b   : > { %v1335_v45 = vmul.f32 %v2392_v44, %v2390_v41  ;;  %v2372_v44 = vld [vmem:[#allocation7] sm:$0xff]  }
 0x67d   : > { %v1337_v48 = vpack.c.bf16 %v1335_v45, %v1335_v45  ;;  %v1336_v49 = vadd.f32 %v1335_v45, %v1132_v46  ;;  %v2374_v45 = vld [vmem:[%s3175_s15 + $0x30] sm:$0xff]   ;;  %v2375_v46 = vld [vmem:[%s3175_s15 + $0x28] sm:$0xff]  }
 0x67f   : > { %2219 = vmatmul.mubr.msk.bf16.vlgmr.msra.gmra.mxu0 %vm1011_vm3, %v1337_v48  ;;  %v2377_v48 = vld [vmem:[%s3175_s15 + $0x18] sm:$0xff]  }
 0x680   : > { %2229 = vmatpush3.bf16.xpose.msra.mxu0 %v1440_v50  ;;  %2230 = vmatprep.mubr.msk.bf16.mxu0 %vm2609_vm0, %v2608_v0 }
 0x681   : > { %2240 = vmatprep.subr.bf16.mxu0 %v2608_v0 }
 0x687   : > { %2231 = vmatmul.mubr.msk.bf16.vlgmr.msra.gmra.mxu0 %vm964_vm2, %v1433_v23 }
 0x688   : > { %2242 = vmatprep.mubr.msk.bf16.mxu0 %vm2609_vm0, %v2608_v0  ;;  %2241 = vmatpush3.bf16.msra.mxu0 %v1546_v9 }
 0x689   : > { %2254 = vmatprep.subr.bf16.mxu0 %v2608_v0 }
 0x73f   : > { %v1378_v52 = vpop.f32.mrf.mxu0 }
 0x740   : > { %v1384_v53 = vpack.c.bf16 %v1378_v52, %v1378_v52  ;;  %v2081_v52 = vld [vmem:[%s3226_s0] ss:$0 sm:$0xff] }
 0x741   : > { %v2220_v54 = vpop.f32.mrf.mxu0 }
 0x742   : > { %2225 = vmatmul.mubr.msk.bf16.vlgmr.msra.gmra.mxu1 %vm964_vm2, %v1384_v53  ;;  %v2082_v54 = vld [vmem:[%s3227_s19] ss:$0 sm:$0xff] }
 0x743   : > { %v1381_v55 = vpop.f32.mrf.mxu0  ;;  %2236 = vmatprep.mubr.msk.bf16.mxu1 %vm2609_vm0, %v2608_v0 }
 0x745   : > { %v2221_v56 = vpop.f32.mrf.mxu0 }
 0x747   : > { %v1476_v57 = vpop.f32.mrf.mxu0 }
 0x748   : > { %v1482_v58 = vsel %vm1011_vm3, %v1476_v57, -inf }
 0x749   : > { %1483 = vmax.xlane.f32.xlu0 %v1482_v58  ;;  %v2232_v59 = vpop.f32.mrf.mxu0  ;;  %v2379_v58 = vld [vmem:[%s3175_s15 + $0x8] sm:$0xff]  }
 0x74a   : > { %v2380_v59 = vld [vmem:[%s3175_s15] sm:$0xff]  }
 0x74b   : > { %v1479_v60 = vpop.f32.mrf.mxu0 }
 0x74c   : > { %v2083_v60 = vld [vmem:[%s3228_s26] ss:$0 sm:$0xff]  ;;  %s2487_s26 = sshll.u32 %s2613_s27, 4  ;;  %s2488_s26 = int_to_ptr.vmem [resolvable:$false] %s2487_s26 }
 0x74d   : > { %v2233_v61 = vpop.f32.mrf.mxu0  ;;  %s2489_s14 = scalar_lea.vmem %s2488_s26, 256  ;;  %p2490_p5 = scmp.lt.s32.totalorder %s1881_s11, %s2488_s26 }
 0x74e   : > { %p2491_p7 = scmp.lt.s32.totalorder %s2489_s14, %s2483_s30 }
 0x750   : > { %p2492_p3 = por %p2491_p7, %p2490_p5 }
 0x752   : > { %p2493_p2 = pnand %p2492_p3, %p2486_p10 }
 0x7d2   : > { %v1484_v62 = vpop.xlane.xlu0 %1483 }
 0x7d3   : > { %v1485_v63 = vsub.f32 %v1476_v57, %v1484_v62 }
 0x7d5   : > { %v1486_v1 = vmul.f32 1.442695, %v1485_v63 }
 0x7d7   : > { %2393 = vpow2.f32 %v1486_v1 }
 0x7e4   : > { %v2394_v2 = vpop.eup %2393 }
 0x7e5   : > { %v1488_v4 = vsel %vm1011_vm3, %v2394_v2, 0.0 }
 0x7e6   : > { %1489 = vadd.xlane.f32.xlu1 %v1488_v4 }
 0x7f7   : > { %1495 = vrot.lane.b32.xlu1 %v2936_v33, %s2612_s28  ;;  %s1852_s28 = scalar_lea.sflag [#allocation10], %s2846_s12 }
 0x802   : > { %v1425_v6 = vpop.f32.mrf.mxu1 }
 0x803   : > { %v1431_v8 = vadd.f32 %v1425_v6, %v1270_v5 }
 0x804   : > { %v2226_v10 = vpop.f32.mrf.mxu1 }
 0x806   : > { %v1428_v11 = vpop.f32.mrf.mxu1 }
 0x808   : > { %v2227_v12 = vpop.f32.mrf.mxu1 }
 0x86f   : > { %v1490_v13 = vpop.xlane.xlu1 %1489 }
 0x870   : > { %2395 = vrcp.f32 %v1490_v13 }
 0x873   : > { %v1496_v33 = vpop.permute.xlu1 %1495 }
 0x874   : > { %2235 = vmatpush3.bf16.msra.mxu1 %v1496_v33 }
 0x875   : > { %2246 = vmatprep.subr.bf16.mxu1 %v2608_v0 }
 0x87d   : > { %v2396_v14 = vpop.eup %2395 }
 0x87e   : > { %v1492_v15 = vmul.f32 %v2396_v14, %v2394_v2 }
 0x880   : > { %v1494_v16 = vpack.c.bf16 %v1492_v15, %v1492_v15  ;;  %v1493_v17 = vadd.f32 %v1492_v15, %v1336_v49  ;;  %v2378_v49 = vld [vmem:[%s3175_s15 + $0x10] sm:$0xff]  }
 0x882   : > { %2237 = vmatmul.mubr.msk.bf16.vlgmr.msra.gmra.mxu1 %vm1011_vm3, %v1494_v16  ;;  %v1843_v18 = vmul.f32 0.25, %v1493_v17 }
 0x883   : > { %2250 = vmatprep.mubr.msk.bf16.mxu1 %vm2609_vm0, %v2608_v0  ;;  %2247 = vmatpush3.bf16.msra.mxu1 %v2371_v43 }
 0x884   : > { %v1844_v19 = vsel %vm1011_vm3, %v1843_v18, 0.0  ;;  %2248 = vmatprep.subr.bf16.mxu1 %v2608_v0 }
 0x885   : > { %1845 = vst [vmem:[%s3030_s18] sm:$0xff] %v1844_v19 }
 0x887   : > { %2249 = vmatpush3.bf16.msra.mxu1 %v2372_v44 }
 0x942   : > { %v1535_v20 = vpop.f32.mrf.mxu1 }
 0x943   : > { %v1541_v21 = vpack.c.bf16 %v1535_v20, %v1535_v20 }
 0x944   : > { %v2238_v22 = vpop.f32.mrf.mxu1 }
 0x945   : > { %2243 = vmatmul.mubr.msk.bf16.vlgmr.msra.gmra.mxu0 %vm964_vm2, %v1541_v21 }
 0x946   : > { %v1538_v24 = vpop.f32.mrf.mxu1  ;;  %2270 = vmatprep.mubr.msk.bf16.mxu0 %vm2609_vm0, %v2608_v0  ;;  %2255 = vmatpush3.bf16.msra.mxu0 %v2373_v3 }
 0x947   : > { %2256 = vmatprep.subr.bf16.mxu0 %v2608_v0 }
 0x948   : > { %v2239_v26 = vpop.f32.mrf.mxu1 }
 0x94a   : > { %2257 = vmatpush3.bf16.msra.mxu0 %v2374_v45 }
 0x94b   : > { %2258 = vmatprep.subr.bf16.mxu0 %v2608_v0 }
 0x94e   : > { %2259 = vmatpush3.bf16.msra.mxu0 %v2375_v46 }
 0x94f   : > { %2260 = vmatprep.subr.bf16.mxu0 %v2608_v0 }
 0x952   : > { %2261 = vmatpush3.bf16.msra.mxu0 %v2376_v47 }
 0x953   : > { %2262 = vmatprep.subr.bf16.mxu0 %v2608_v0 }
 0x956   : > { %2263 = vmatpush3.bf16.msra.mxu0 %v2377_v48 }
 0x957   : > { %2264 = vmatprep.subr.bf16.mxu0 %v2608_v0 }
 0x95a   : > { %2265 = vmatpush3.bf16.msra.mxu0 %v2378_v49 }
 0x95b   : > { %2266 = vmatprep.subr.bf16.mxu0 %v2608_v0 }
 0x95e   : > { %2267 = vmatpush3.bf16.msra.mxu0 %v2379_v58 }
 0x95f   : > { %2268 = vmatprep.subr.bf16.mxu0 %v2608_v0  ;;  %v2087_v0 = vld [vmem:[%s3229_s21] ss:$0 sm:$0xff] }
 0x962   : > { %2269 = vmatpush3.bf16.msra.mxu0 %v2380_v59 }
 0xa05   : > { %v1582_v27 = vpop.f32.mrf.mxu0 }
 0xa06   : > { %v1588_v29 = vadd.f32 %v1582_v27, %v1431_v8 }
 0xa07   : > { %v2244_v31 = vpop.f32.mrf.mxu0 }
 0xa08   : > { %v1596_v32 = vadd.f32 %v2080_v28, %v1588_v29 }
 0xa09   : > { %v1585_v34 = vpop.f32.mrf.mxu0 }
 0xa0a   : > { %v1598_v35 = vadd.f32 %v1597_v30, %v1596_v32 }
 0xa0b   : > { %v2245_v36 = vpop.f32.mrf.mxu0 }
 0xa0c   : > { %v1601_v37 = vsel %vm776_vm1, %v1598_v35, 0.0 }
 0xa0d   : > { %1602 = vadd.xlane.f32.xlu1 %v1601_v37 }
 0xa96   : > { %v1603_v38 = vpop.xlane.xlu1 %1602 }
 0xa97   : > { %v1605_v39 = vmul.f32 0.03125, %v1603_v38 }
 0xa99   : > { %v1606_v40 = vsub.f32 %v1598_v35, %v1605_v39 }
 0xa9b   : > { %v1607_v41 = vmul.f32 %v1606_v40, %v1606_v40 }
 0xa9d   : > { %v1608_v42 = vsel %vm776_vm1, %v1607_v41, 0.0 }
 0xa9e   : > { %1609 = vadd.xlane.f32.xlu0 %v1608_v42 }
 0xb27   : > { %v1610_v50 = vpop.xlane.xlu0 %1609 }
 0xb28   : > { %v1611_v23 = vmul.f32 0.03125, %v1610_v50 }
 0xb2a   : > { %v1612_v25 = vadd.f32 1e-05, %v1611_v23 }
 0xb2c   : > { %2397 = vrsqrt.f32 %v1612_v25 }
 0xb39   : > { %v2398_v51 = vpop.eup %2397 }
 0xb3a   : > { %v1614_v53 = vmul.f32 %v2398_v51, %v1606_v40 }
 0xb3c   : > { %v1621_v55 = vmul.f32 %v2081_v52, %v1614_v53 }
 0xb3e   : > { %v1628_v56 = vadd.f32 %v2082_v54, %v1621_v55 }
 0xb40   : > { %v1629_v57 = vpack.c.bf16 %v1628_v56, %v1628_v56 }
 0xb42   : > { %2251 = vmatmul.mubr.msk.bf16.vlgmr.msra.gmra.mxu1 %vm776_vm1, %v1629_v57 }
 0xc02   : > { %v1690_v61 = vpop.f32.mrf.mxu1 }
 0xc03   : > { %v1691_v62 = vadd.f32 %v2083_v60, %v1690_v61 }
 0xc04   : > { %v2252_v63 = vpop.f32.mrf.mxu1 }
 0xc05   : > { %v1696_v1 = vmax.f32 %v1691_v62, 0.0 }
 0xc06   : > { %v1693_v2 = vpop.f32.mrf.mxu1 }
 0xc07   : > { %v1697_v4 = vpack.c.bf16 %v1696_v1, %v1696_v1 }
 0xc08   : > { %v2253_v5 = vpop.f32.mrf.mxu1 }
 0xc09   : > { %2271 = vmatmul.mubr.bf16.vlgmr.msra.gmra.mxu0 %v1697_v4 }
 0xcc9   : > { %v1803_v6 = vpop.f32.mrf.mxu0 }
 0xcca   : > { %v1804_v7 = vadd.f32 %v2087_v0, %v1803_v6 }
 0xccb   : > { %v2272_v8 = vpop.f32.mrf.mxu0 }
 0xccc   : > { %v1809_v9 = vadd.f32 %v1804_v7, %v1628_v56 }
 0xccd   : > { %v1806_v10 = vpop.f32.mrf.mxu0 }
 0xcce   : > { %v1812_v11 = vsel %vm776_vm1, %v1809_v9, 0.0 }
 0xccf   : > { %1813 = vadd.xlane.f32.xlu0 %v1812_v11  ;;  %v2273_v12 = vpop.f32.mrf.mxu0 }
 0xd58   : > { %v1814_v13 = vpop.xlane.xlu0 %1813 }
 0xd59   : > { %v1815_v33 = vmul.f32 0.03125, %v1814_v13 }
 0xd5b   : > { %v1816_v14 = vsub.f32 %v1809_v9, %v1815_v33 }
 0xd5d   : > { %v1817_v15 = vmul.f32 %v1816_v14, %v1816_v14 }
 0xd5f   : > { %v1818_v16 = vsel %vm776_vm1, %v1817_v15, 0.0 }
 0xd60   : > { %1819 = vadd.xlane.f32.xlu0 %v1818_v16 }
 0xd61   : > { %2496 = shalt.err (!%p2493_p2)
}
 0xd62   : > { %s2497_s20 = scalar_lea.hbm %s1878_s2, 128  ;;  %s2501_s29 = scalar_lea.hbm %s3231_s13, 256 }
 0xd63   : > { %p2498_p6 = scmp.ne.s32.totalorder %s1878_s2, %s2497_s20  ;;  %p2502_p13 = scmp.lt.s32.totalorder %s1878_s2, %s3231_s13 }
 0xd64   : > { %p2503_p11 = scmp.lt.s32.totalorder %s2501_s29, %s2497_s20 }
 0xd65   : > { %p2499_p9 = pnand %p2498_p6, %p2803_p0 }
 0xd66   : > { %p2504_p8 = por %p2503_p11, %p2502_p13 }
 0xd67   : > { %p2500_p12 = pneg %p2499_p9 }
 0xd69   : > { %p2505_p1 = pnand %p2504_p8, %p2500_p12 }
 0xd6b   : > { %2508 = shalt.err (!%p2505_p1)
}
 0xd6c   : > { %2283 = dma.vmem_to_hbm [thread:$0]  (%p2803_p0), %s1881_s11, 128, %s1878_s2, %s1852_s28   ;;  %v1839_v22 = vld [vmem:[%s2855_s4] sm:$0xf] }
 0xd6d   : > { %s3232_s1 = sld [smem:[#allocation32_spill]]  ;;  %v1840_v28 = vunpack.c.l.bf16 %v1839_v22  ;;  %s736_s2 = scalar_lea.vmem [#allocation8], %s2051_s17 }
 0xd6e   : > { %s3233_s20 = sld [smem:[#allocation33_spill]]  ;;  %s1866_s11 = sshll.u32 %s736_s2, 4  ;;  %s1867_s11 = int_to_ptr.vmem [resolvable:$true] %s1866_s11 }
 0xd6f   : > { %s3234_s28 = sshll.u32 %s2593_s24, 7  ;;  %s3235_s29 = sld [smem:[#allocation34_spill]] }
 0xd70   : > { %s1847_s4 = scalar_lea.sflag [#allocation4], %s2846_s12  ;;  %s2509_s30 = scalar_lea.vmem %s1867_s11, 128 }
 0xd71   : > { %p2510_p4 = scmp.ne.s32.totalorder %s1867_s11, %s2509_s30  ;;  %s2614_s27 = smov [#allocation8]  }
 0xd73   : > { %v2096_v21 = vld [vmem:[%s3232_s1] ss:$0 sm:$0xff]  ;;  %p2511_p10 = pnand %p2510_p4, %p2803_p0  ;;  %s2513_s1 = sshll.u32 %s2614_s27, 4  ;;  %s2514_s1 = int_to_ptr.vmem [resolvable:$false] %s2513_s1 }
 0xd74   : > { %v2097_v26 = vld [vmem:[%s3233_s20] ss:$0 sm:$0xff]  ;;  %s2515_s17 = scalar_lea.vmem %s2514_s1, 256  ;;  %p2516_p7 = scmp.lt.s32.totalorder %s1867_s11, %s2514_s1 }
 0xd75   : > { %s1864_s19 = scalar_lea.hbm %s3235_s29, %s3234_s28  ;;  %p2512_p5 = pneg %p2511_p10 }
 0xd76   : > { %p2517_p3 = scmp.lt.s32.totalorder %s2515_s17, %s2509_s30 }
 0xd78   : > { %p2518_p2 = por %p2517_p3, %p2516_p7 }
 0xd7a   : > { %p2519_p6 = pnand %p2518_p2, %p2512_p5 }
 0xde9   : > { %v1820_v17 = vpop.xlane.xlu0 %1819 }
 0xdea   : > { %v1821_v18 = vmul.f32 0.03125, %v1820_v17 }
 0xdec   : > { %v1822_v19 = vadd.f32 1e-05, %v1821_v18 }
 0xdee   : > { %2399 = vrsqrt.f32 %v1822_v19 }
 0xdfb   : > { %v2400_v20 = vpop.eup %2399 }
 0xdfc   : > { %v1824_v24 = vmul.f32 %v2400_v20, %v1816_v14 }
 0xdfe   : > { %v1831_v27 = vmul.f32 %v2096_v21, %v1824_v24 }
 0xe00   : > { %v1838_v29 = vadd.f32 %v2097_v26, %v1831_v27 }
 0xe02   : > { %v1841_v30 = vadd.f32 %v1840_v28, %v1838_v29 }
 0xe04   : > { %1842 = vst.msk [vmem:[%s736_s2] sm:$0xff] %vm776_vm1, %v1841_v30 }
 0xe05   : > { %2522 = shalt.err (!%p2519_p6)
}
 0xe06   : > { %s2523_s24 = scalar_lea.hbm %s1864_s19, 128  ;;  %s2527_s14 = scalar_lea.hbm %s3235_s29, 256 }
 0xe07   : > { %p2524_p9 = scmp.ne.s32.totalorder %s1864_s19, %s2523_s24  ;;  %p2528_p11 = scmp.lt.s32.totalorder %s1864_s19, %s3235_s29 }
 0xe08   : > { %p2529_p8 = scmp.lt.s32.totalorder %s2527_s14, %s2523_s24 }
 0xe09   : > { %p2525_p12 = pnand %p2524_p9, %p2803_p0 }
 0xe0a   : > { %p2530_p1 = por %p2529_p8, %p2528_p11 }
 0xe0b   : > { %p2526_p13 = pneg %p2525_p12 }
 0xe0d   : > { %p2531_p4 = pnand %p2530_p1, %p2526_p13 }
 0xe0f   : > { %2534 = shalt.err (!%p2531_p4)
}
 0xe10   : > { %2282 = dma.vmem_to_hbm [thread:$0]  (%p2803_p0), %s1867_s11, 128, %s1864_s19, %s1847_s4  }
 0xe11 PF: > { %s3236_s28 = sld [smem:[#allocation16_spill]]  ;;  %p3239_p5 = scmp.ge.s32.totalorder %s2601_s25, 2 }
 0xe12   : > { %s3237_s18 = sld [smem:[#allocation18_spill]] }
 0xe17   : > { %s1892_s21 = sand.u32 1, %s3236_s28  }
 0xe18   : > { %p3238_p10 = scmp.ne.s32.totalorder %s3237_s18, 0  ;;  %s1893_s30 = scalar_lea.sflag [#allocation4], %s1892_s21 }
 0xe1a   : > { %p2298_p7 = pnand %p3239_p5, %p3238_p10 }
 0xe1c   : > { %p2299_p3 = pneg %p2298_p7 }
 0xe1e   : > { %2572 = dma.done.wait (%p2299_p3), %s1893_s30, 128  }
 0xe1f   : > { %2574 = vsyncadd (%p2299_p3), %s1893_s30, 4294967168  ;;  %s1902_s27 = scalar_lea.sflag [#allocation10], %s1892_s21 }
 0xe20   : > { %2576 = dma.done.wait (%p2299_p3), %s1902_s27, 128  }
 0xe21   : > { %2578 = vsyncadd (%p2299_p3), %s1902_s27, 4294967168  ;;  %s43_s25 = sadd.s32 1, %s2601_s25   ;;  %s3240_s0 = sld [smem:[#allocation21_spill]] }
 0xe22   : > { %p40_p2 = scmp.ge.s32.totalorder %s43_s25, 4   ;;  %s3241_s24 = sld [smem:[#allocation17_spill]] }
 0xe23   : > { %s3242_s2 = sld [smem:[#allocation19_spill]]  ;;  %s3243_s1 = smov %s2585_s22 }
 0xe24   : > { %s3244_s22 = smov %s2589_s23  ;;  %42 = sbr.rel (!%p40_p2) target bundleno = 25 (0x19), region = 178 }
 0xe27   : > { %s3245_s23 = smov %s3240_s0 }
 0xe29   :  { %1907 = vsyncpa [#allocation3], 1 }
 0xe2a   :  { %1909 = vsyncpa [#allocation3 + $0x1], 1 }
 0xe2b   :  { %1910 = vsyncpa [#allocation6], 1 }
 0xe2c   :  { %1912 = vsyncpa [#allocation6 + $0x1], 1 }
 0xe2d   :  { %1913 = vsyncpa [#allocation4], 1 }
 0xe2e   :  { %1915 = vsyncpa [#allocation4 + $0x1], 1 }
 0xe2f   :  { %1916 = vsyncpa [#allocation10], 1 }
 0xe30   :  { %1918 = vsyncpa [#allocation10 + $0x1], 1 }

</bundles_post_ra>
